<compile_context>
chip_gen: v7x
topology: tpu7x:2x2x1
jax: 0.10.0
libtpu: 0.0.40
codegen_flags: <defaults>
</compile_context>

<pallas_src>
import numpy as np
import jax
import jax.numpy as jnp
from jax import lax
from jax.experimental import pallas as pl
from jax.experimental.pallas import tpu as pltpu

# ---------------- model hyper-params (small, deterministic) ----------------
B = 2            # batch
L = 8            # sequence length
D = 32           # d_model
H = 4            # n_heads
DH = D // H      # head dim
DFF = 64         # d_ff
MOVING_AVG = 5   # odd window for series decomposition
NUM_LAYERS = 2
LN_EPS = 1e-5
BL = B * L       # folded batch*seq rows
HBL = H * BL     # folded head*batch*seq rows
HD = H * D       # stacked-weight contraction dim (= 128)
NEG_INF = -1e9


def build_avg_matrix(seq_len: int, kernel: int) -> np.ndarray:
    """Matrix A with (A @ x) == moving_avg(x) using replicate padding,
    matching Autoformer's series_decomp / AvgPool1d(stride=1)."""
    pad = (kernel - 1) // 2
    A = np.zeros((seq_len, seq_len), dtype=np.float32)
    for i in range(seq_len):
        for p in range(i, i + kernel):                 # window in padded coords
            j = min(max(p - pad, 0), seq_len - 1)
            A[i, j] += 1.0 / kernel
    return A


# ----------------------------- Pallas kernel --------------------------------
def encoder_fused_kernel(
        x_ref,
        wq_ref, wk_ref, wv_ref, bq_ref, bk_ref, bv_ref,
        wo_ref, bo_ref, w1_ref, w2_ref,
        mdec_ref, msub_ref, xbd_mask_ref, cbd_mask_ref, esum_ref, amask_ref,
        gamma_ref, beta_ref,
        out_ref, attn_ref):
    f32 = jnp.float32
    bf16 = jnp.bfloat16

    x = x_ref[...]                       # [BL, D]  residual stream (f32)
    mdec = mdec_ref[...]                 # [BL, BL] (I - blockdiag(moving_avg))
    xbd_mask = xbd_mask_ref[...]         # [HBL, HD] 0/1 block-diag over heads
    cbd_mask = cbd_mask_ref[...]         # [HBL, D]  0/1 block-diag over heads
    esum = esum_ref[...]                 # [BL, HBL] bf16 head-sum/fold-back
    amask = amask_ref[...]               # [HBL, HBL] additive (batch,head) mask
    scale = 1.0 / (DH ** 0.5)

    attn_maps = []
    for li in range(NUM_LAYERS):         # static unroll over layers
        # ---- head-folded Q/K/V projections: one dot each, full K = 128 ----
        # xbd[(h,n), (g,:)] = x[n,:] if g == h else 0   (row-replicate + mask)
        xbd = (jnp.tile(x, (H, H)) * xbd_mask).astype(bf16)           # [HBL, HD]
        qf = jnp.dot(xbd, wq_ref[li], preferred_element_type=f32) + bq_ref[li]
        kf = jnp.dot(xbd, wk_ref[li], preferred_element_type=f32) + bk_ref[li]
        vf = jnp.dot(xbd, wv_ref[li], preferred_element_type=f32) + bv_ref[li]

        # ---- attention core: two plain 2-D dots over folded rows ----
        s = lax.dot_general(qf.astype(bf16), kf.astype(bf16),
                            (((1,), (1,)), ((), ())),
                            preferred_element_type=f32)               # [HBL, HBL]
        s = s * scale + amask                   # kill cross-batch / cross-head
        m = jnp.max(s, axis=-1, keepdims=True)
        e = jnp.exp(s - m)
        a = e * pl.reciprocal(jnp.sum(e, axis=-1, keepdims=True), approx=False)
        attn_maps.append(a)

        cf = jnp.dot(a.astype(bf16), vf.astype(bf16),
                     preferred_element_type=f32)                      # [HBL, DH]

        # ---- fold heads back onto lanes, output projection ----
        cbd = (jnp.tile(cf, (1, H)) * cbd_mask).astype(bf16)          # [HBL, D]
        cunf = jnp.dot(esum, cbd, preferred_element_type=f32)         # [BL, D]
        new_x = (jnp.dot(cunf.astype(bf16), wo_ref[li],
                         preferred_element_type=f32) + bo_ref[li])

        # ---- residual + series_decomp #1  ==  (I - Avg) @ (x + new_x) ----
        x1 = jnp.dot(mdec, x + new_x, preferred_element_type=f32)

        # ---- pointwise Conv1d FFN (bias=False), ReLU ----
        h1 = jnp.maximum(jnp.dot(x1.astype(bf16), w1_ref[li],
                                 preferred_element_type=f32), 0.0)
        y = jnp.dot(h1.astype(bf16), w2_ref[li], preferred_element_type=f32)

        # ---- residual + series_decomp #2 ----
        x = jnp.dot(mdec, x1 + y, preferred_element_type=f32)

    # ---- my_Layernorm: feature LayerNorm then subtract per-sequence mean ----
    mu = jnp.mean(x, axis=-1, keepdims=True)
    var = jnp.mean((x - mu) ** 2, axis=-1, keepdims=True)     # biased variance
    x_hat = (x - mu) * lax.rsqrt(var + LN_EPS) * gamma_ref[...] + beta_ref[...]
    out_ref[...] = jnp.dot(msub_ref[...], x_hat, preferred_element_type=f32)

    # single lane-dense (128-lane) store of both layers' attention maps
    attn_ref[...] = jnp.concatenate(attn_maps, axis=1)         # [HBL, NL*HBL]


# --------------------- static weight / constant preparation ------------------
def prepare_encoder_inputs(layer_params, norm_params):
    """All layout plumbing done ONCE at init time (outside the jitted forward)."""
    A = build_avg_matrix(L, MOVING_AVG)
    eye_b = np.eye(B, dtype=np.float32)
    m_dec = np.eye(BL, dtype=np.float32) - np.kron(eye_b, A).astype(np.float32)
    m_sub = np.eye(BL, dtype=np.float32) - np.kron(
        eye_b, np.full((L, L), 1.0 / L, np.float32)).astype(np.float32)
    xbd_mask = np.kron(np.eye(H, dtype=np.float32), np.ones((BL, D), np.float32))
    cbd_mask = np.kron(np.eye(H, dtype=np.float32), np.ones((BL, DH), np.float32))
    esum = np.tile(np.eye(BL, dtype=np.float32), (1, H))               # [BL, HBL]
    blocks = np.kron(np.eye(H * B, dtype=np.float32), np.ones((L, L), np.float32))
    amask = np.where(blocks > 0.0, 0.0, NEG_INF).astype(np.float32)    # [HBL, HBL]

    def stack_heads(w):    # [D, D] -> [H*D, DH]  (per-head weight blocks stacked)
        return np.asarray(w, np.float32).reshape(D, H, DH).transpose(1, 0, 2) \
                 .reshape(H * D, DH)

    def fold_bias(b):      # [1, D] -> [HBL, DH]  (head-major row-folded bias)
        return np.repeat(np.asarray(b, np.float32).reshape(H, DH), BL, axis=0)

    bf = jnp.bfloat16
    return {
        "wq": jnp.asarray(np.stack([stack_heads(p["wq"]) for p in layer_params]), bf),
        "wk": jnp.asarray(np.stack([stack_heads(p["wk"]) for p in layer_params]), bf),
        "wv": jnp.asarray(np.stack([stack_heads(p["wv"]) for p in layer_params]), bf),
        "bq": jnp.asarray(np.stack([fold_bias(p["bq"]) for p in layer_params])),
        "bk": jnp.asarray(np.stack([fold_bias(p["bk"]) for p in layer_params])),
        "bv": jnp.asarray(np.stack([fold_bias(p["bv"]) for p in layer_params])),
        "wo": jnp.asarray(np.stack([np.asarray(p["wo"], np.float32)
                                    for p in layer_params]), bf),
        "bo": jnp.asarray(np.stack([np.asarray(p["bo"], np.float32)
                                    for p in layer_params])),
        "w1": jnp.asarray(np.stack([np.asarray(p["w1"], np.float32)
                                    for p in layer_params]), bf),
        "w2": jnp.asarray(np.stack([np.asarray(p["w2"], np.float32)
                                    for p in layer_params]), bf),
        "m_dec": jnp.asarray(m_dec),
        "m_sub": jnp.asarray(m_sub),
        "xbd_mask": jnp.asarray(xbd_mask),
        "cbd_mask": jnp.asarray(cbd_mask),
        "esum": jnp.asarray(esum, bf),
        "amask": jnp.asarray(amask),
        "gamma": jnp.asarray(norm_params["gamma"], jnp.float32),
        "beta": jnp.asarray(norm_params["beta"], jnp.float32),
    }


# ------------------------------ forward wrapper -------------------------------
def encoder_forward(x, prep):
    xf = x.reshape(BL, D)                                     # fold batch into rows

    args = (xf,
            prep["wq"], prep["wk"], prep["wv"],
            prep["bq"], prep["bk"], prep["bv"],
            prep["wo"], prep["bo"], prep["w1"], prep["w2"],
            prep["m_dec"], prep["m_sub"], prep["xbd_mask"], prep["cbd_mask"],
            prep["esum"], prep["amask"], prep["gamma"], prep["beta"])

    vmem_spec = pl.BlockSpec(memory_space=pltpu.MemorySpace.VMEM)
    out_flat, attn_flat = pl.pallas_call(
        encoder_fused_kernel,
        out_shape=(jax.ShapeDtypeStruct((BL, D), jnp.float32),
                   jax.ShapeDtypeStruct((HBL, NUM_LAYERS * HBL), jnp.float32)),
        in_specs=[vmem_spec] * len(args),
        out_specs=(vmem_spec, vmem_spec),
    )(*args)

    y = out_flat.reshape(B, L, D)
    # extract per-(batch, head) L x L blocks from the folded maps (tiny, XLA side)
    attns = []
    for li in range(NUM_LAYERS):
        m = attn_flat[:, li * HBL:(li + 1) * HBL].reshape(H, B, L, H, B, L)
        blocks = jnp.stack(
            [jnp.stack([m[h, b, :, h, b, :] for h in range(H)], axis=0)
             for b in range(B)], axis=0)                     # [B, H, L, L]
        attns.append(blocks)
    return y, attns


# --------------------------- pure-JAX reference -------------------------------
def encoder_reference(x, layer_params, norm_params, A):
    def decomp_res(u):
        return u - jnp.einsum('ij,bjd->bid', A, u)

    xs = x
    attns = []
    for p in layer_params:
        q = xs @ p["wq"] + p["bq"]
        k = xs @ p["wk"] + p["bk"]
        v = xs @ p["wv"] + p["bv"]
        qh = q.reshape(B, L, H, DH)
        kh = k.reshape(B, L, H, DH)
        vh = v.reshape(B, L, H, DH)
        s = jnp.einsum('blhd,bmhd->bhlm', qh, kh) / (DH ** 0.5)
        a = jax.nn.softmax(s, axis=-1)
        attns.append(a)
        ctx = jnp.einsum('bhlm,bmhd->blhd', a, vh).reshape(B, L, D)
        new_x = ctx @ p["wo"] + p["bo"]
        x1 = decomp_res(xs + new_x)
        y = jnp.maximum(x1 @ p["w1"], 0.0) @ p["w2"]
        xs = decomp_res(x1 + y)
    mu = xs.mean(-1, keepdims=True)
    var = ((xs - mu) ** 2).mean(-1, keepdims=True)
    xh = (xs - mu) * lax.rsqrt(var + LN_EPS) * norm_params["gamma"] + norm_params["beta"]
    return xh - xh.mean(axis=1, keepdims=True), attns


# ------------------------------ init / main -----------------------------------
def init_layer_params(key):
    ks = jax.random.split(key, 10)
    s = 0.05
    return {
        "wq": s * jax.random.normal(ks[0], (D, D), jnp.float32),
        "bq": s * jax.random.normal(ks[1], (1, D), jnp.float32),
        "wk": s * jax.random.normal(ks[2], (D, D), jnp.float32),
        "bk": s * jax.random.normal(ks[3], (1, D), jnp.float32),
        "wv": s * jax.random.normal(ks[4], (D, D), jnp.float32),
        "bv": s * jax.random.normal(ks[5], (1, D), jnp.float32),
        "wo": s * jax.random.normal(ks[6], (D, D), jnp.float32),
        "bo": s * jax.random.normal(ks[7], (1, D), jnp.float32),
        "w1": s * jax.random.normal(ks[8], (D, DFF), jnp.float32),   # conv1, bias=False
        "w2": s * jax.random.normal(ks[9], (DFF, D), jnp.float32),   # conv2, bias=False
    }


if __name__ == "__main__":
    key = jax.random.PRNGKey(0)
    k_x, k_l0, k_l1 = jax.random.split(key, 3)

    x = jax.random.normal(k_x, (B, L, D), jnp.float32)
    layer_params = [init_layer_params(k_l0), init_layer_params(k_l1)]
    norm_params = {"gamma": jnp.ones((1, D), jnp.float32),
                   "beta": jnp.zeros((1, D), jnp.float32)}

    prep = prepare_encoder_inputs(layer_params, norm_params)   # once, outside jit

    fwd = jax.jit(encoder_forward)
    y, attns = jax.block_until_ready(fwd(x, prep))

    # ---- sanity checks ----
    assert y.shape == (B, L, D)
    assert len(attns) == NUM_LAYERS and attns[0].shape == (B, H, L, L)
    attns_np = [np.asarray(a) for a in attns]
    for a in attns_np:
        assert np.allclose(a.sum(-1), 1.0, atol=1e-3)          # exact softmax rows
    assert np.all(np.isfinite(np.asarray(y)))

    # ---- loose parity check vs. pure-JAX f32 reference (kernel uses bf16 MXU) ----
    A_np = jnp.asarray(build_avg_matrix(L, MOVING_AVG))
    y_ref, attns_ref = encoder_reference(x, layer_params, norm_params, A_np)
    assert np.max(np.abs(np.asarray(y) - np.asarray(y_ref))) < 0.25
    for a, ar in zip(attns_np, attns_ref):
        assert np.max(np.abs(a - np.asarray(ar))) < 0.03

    print("KERNEL_OK")
</pallas_src>

<mosaic_0001>
module attributes {stable_mosaic.version = 11 : i64} {
  func.func @encoder_fused_kernel(%arg0: memref<16x32xf32, #tpu.memory_space<vmem>>, %arg1: memref<2x128x8xbf16, #tpu.memory_space<vmem>>, %arg2: memref<2x128x8xbf16, #tpu.memory_space<vmem>>, %arg3: memref<2x128x8xbf16, #tpu.memory_space<vmem>>, %arg4: memref<2x64x8xf32, #tpu.memory_space<vmem>>, %arg5: memref<2x64x8xf32, #tpu.memory_space<vmem>>, %arg6: memref<2x64x8xf32, #tpu.memory_space<vmem>>, %arg7: memref<2x32x32xbf16, #tpu.memory_space<vmem>>, %arg8: memref<2x1x32xf32, #tpu.memory_space<vmem>>, %arg9: memref<2x32x64xbf16, #tpu.memory_space<vmem>>, %arg10: memref<2x64x32xbf16, #tpu.memory_space<vmem>>, %arg11: memref<16x16xf32, #tpu.memory_space<vmem>>, %arg12: memref<16x16xf32, #tpu.memory_space<vmem>>, %arg13: memref<64x128xf32, #tpu.memory_space<vmem>>, %arg14: memref<64x32xf32, #tpu.memory_space<vmem>>, %arg15: memref<16x64xbf16, #tpu.memory_space<vmem>>, %arg16: memref<64x64xf32, #tpu.memory_space<vmem>>, %arg17: memref<1x32xf32, #tpu.memory_space<vmem>>, %arg18: memref<1x32xf32, #tpu.memory_space<vmem>>, %arg19: memref<16x32xf32, #tpu.memory_space<vmem>>, %arg20: memref<64x128xf32, #tpu.memory_space<vmem>>) attributes {dimension_semantics = [], scalar_prefetch = 0 : i64, scratch_operands = 0 : i64, tpu.core_type = #tpu.core_type<tc>} {
    %c0 = arith.constant 0 : index
    %c0_0 = arith.constant 0 : index
    %0 = vector.load %arg0[%c0, %c0_0] : memref<16x32xf32, #tpu.memory_space<vmem>>, vector<16x32xf32>
    %c0_1 = arith.constant 0 : index
    %c0_2 = arith.constant 0 : index
    %1 = vector.load %arg11[%c0_1, %c0_2] : memref<16x16xf32, #tpu.memory_space<vmem>>, vector<16x16xf32>
    %c0_3 = arith.constant 0 : index
    %c0_4 = arith.constant 0 : index
    %2 = vector.load %arg13[%c0_3, %c0_4] : memref<64x128xf32, #tpu.memory_space<vmem>>, vector<64x128xf32>
    %c0_5 = arith.constant 0 : index
    %c0_6 = arith.constant 0 : index
    %3 = vector.load %arg14[%c0_5, %c0_6] : memref<64x32xf32, #tpu.memory_space<vmem>>, vector<64x32xf32>
    %c0_7 = arith.constant 0 : index
    %c0_8 = arith.constant 0 : index
    %4 = vector.load %arg15[%c0_7, %c0_8] : memref<16x64xbf16, #tpu.memory_space<vmem>>, vector<16x64xbf16>
    %c0_9 = arith.constant 0 : index
    %c0_10 = arith.constant 0 : index
    %5 = vector.load %arg16[%c0_9, %c0_10] : memref<64x64xf32, #tpu.memory_space<vmem>>, vector<64x64xf32>
    %6 = tpu.concatenate %0, %0, %0, %0 in 0 : vector<16x32xf32>, vector<16x32xf32>, vector<16x32xf32>, vector<16x32xf32> -> vector<64x32xf32>
    %7 = tpu.concatenate %6, %6, %6, %6 in 1 : vector<64x32xf32>, vector<64x32xf32>, vector<64x32xf32>, vector<64x32xf32> -> vector<64x128xf32>
    %8 = arith.mulf %7, %2 : vector<64x128xf32>
    %9 = arith.truncf %8 : vector<64x128xf32> to vector<64x128xbf16>
    %c0_11 = arith.constant 0 : index
    %c0_12 = arith.constant 0 : index
    %c0_13 = arith.constant 0 : index
    %10 = vector.load %arg1[%c0_11, %c0_12, %c0_13] : memref<2x128x8xbf16, #tpu.memory_space<vmem>>, vector<1x128x8xbf16>
    %11 = vector.shape_cast %10 : vector<1x128x8xbf16> to vector<128x8xbf16>
    %cst = arith.constant dense<0.000000e+00> : vector<64x8xf32>
    %12 = tpu.matmul %9, %11, %cst {dimension_numbers = #tpu.dot_dimension_numbers<[1], [0], [0], [1], [0, 0, 1, 1], [], []>} : vector<64x128xbf16>, vector<128x8xbf16>, vector<64x8xf32> -> vector<64x8xf32>
    %c0_14 = arith.constant 0 : index
    %c0_15 = arith.constant 0 : index
    %c0_16 = arith.constant 0 : index
    %13 = vector.load %arg4[%c0_14, %c0_15, %c0_16] : memref<2x64x8xf32, #tpu.memory_space<vmem>>, vector<1x64x8xf32>
    %14 = vector.shape_cast %13 : vector<1x64x8xf32> to vector<64x8xf32>
    %15 = arith.addf %12, %14 : vector<64x8xf32>
    %c0_17 = arith.constant 0 : index
    %c0_18 = arith.constant 0 : index
    %c0_19 = arith.constant 0 : index
    %16 = vector.load %arg2[%c0_17, %c0_18, %c0_19] : memref<2x128x8xbf16, #tpu.memory_space<vmem>>, vector<1x128x8xbf16>
    %17 = vector.shape_cast %16 : vector<1x128x8xbf16> to vector<128x8xbf16>
    %cst_20 = arith.constant dense<0.000000e+00> : vector<64x8xf32>
    %18 = tpu.matmul %9, %17, %cst_20 {dimension_numbers = #tpu.dot_dimension_numbers<[1], [0], [0], [1], [0, 0, 1, 1], [], []>} : vector<64x128xbf16>, vector<128x8xbf16>, vector<64x8xf32> -> vector<64x8xf32>
    %c0_21 = arith.constant 0 : index
    %c0_22 = arith.constant 0 : index
    %c0_23 = arith.constant 0 : index
    %19 = vector.load %arg5[%c0_21, %c0_22, %c0_23] : memref<2x64x8xf32, #tpu.memory_space<vmem>>, vector<1x64x8xf32>
    %20 = vector.shape_cast %19 : vector<1x64x8xf32> to vector<64x8xf32>
    %21 = arith.addf %18, %20 : vector<64x8xf32>
    %c0_24 = arith.constant 0 : index
    %c0_25 = arith.constant 0 : index
    %c0_26 = arith.constant 0 : index
    %22 = vector.load %arg3[%c0_24, %c0_25, %c0_26] : memref<2x128x8xbf16, #tpu.memory_space<vmem>>, vector<1x128x8xbf16>
    %23 = vector.shape_cast %22 : vector<1x128x8xbf16> to vector<128x8xbf16>
    %cst_27 = arith.constant dense<0.000000e+00> : vector<64x8xf32>
    %24 = tpu.matmul %9, %23, %cst_27 {dimension_numbers = #tpu.dot_dimension_numbers<[1], [0], [0], [1], [0, 0, 1, 1], [], []>} : vector<64x128xbf16>, vector<128x8xbf16>, vector<64x8xf32> -> vector<64x8xf32>
    %c0_28 = arith.constant 0 : index
    %c0_29 = arith.constant 0 : index
    %c0_30 = arith.constant 0 : index
    %25 = vector.load %arg6[%c0_28, %c0_29, %c0_30] : memref<2x64x8xf32, #tpu.memory_space<vmem>>, vector<1x64x8xf32>
    %26 = vector.shape_cast %25 : vector<1x64x8xf32> to vector<64x8xf32>
    %27 = arith.addf %24, %26 : vector<64x8xf32>
    %28 = arith.truncf %15 : vector<64x8xf32> to vector<64x8xbf16>
    %29 = arith.truncf %21 : vector<64x8xf32> to vector<64x8xbf16>
    %cst_31 = arith.constant dense<0.000000e+00> : vector<64x64xf32>
    %30 = tpu.matmul %28, %29, %cst_31 {dimension_numbers = #tpu.dot_dimension_numbers<[1], [1], [0], [0], [0, 0, 1, 0], [], []>} : vector<64x8xbf16>, vector<64x8xbf16>, vector<64x64xf32> -> vector<64x64xf32>
    %cst_32 = arith.constant 0.353553385 : f32
    %31 = vector.broadcast %cst_32 : f32 to vector<64x64xf32>
    %32 = arith.mulf %30, %31 : vector<64x64xf32>
    %33 = arith.addf %32, %5 : vector<64x64xf32>
    %cst_33 = arith.constant dense<0xFF800000> : vector<64xf32>
    %34 = vector.multi_reduction <maximumf>, %33, %cst_33 [1] : vector<64x64xf32> to vector<64xf32>
    %35 = vector.shape_cast %34 : vector<64xf32> to vector<64x1xf32>
    %36 = vector.broadcast %35 : vector<64x1xf32> to vector<64x64xf32>
    %37 = arith.subf %33, %36 : vector<64x64xf32>
    %38 = math.exp %37 : vector<64x64xf32>
    %cst_34 = arith.constant dense<0.000000e+00> : vector<64xf32>
    %39 = vector.multi_reduction <add>, %38, %cst_34 [1] : vector<64x64xf32> to vector<64xf32>
    %40 = vector.shape_cast %39 : vector<64xf32> to vector<64x1xf32>
    %41 = tpu.reciprocal %40 : vector<64x1xf32> -> vector<64x1xf32>
    %42 = vector.broadcast %41 : vector<64x1xf32> to vector<64x64xf32>
    %43 = arith.mulf %38, %42 : vector<64x64xf32>
    %44 = arith.truncf %43 : vector<64x64xf32> to vector<64x64xbf16>
    %45 = arith.truncf %27 : vector<64x8xf32> to vector<64x8xbf16>
    %cst_35 = arith.constant dense<0.000000e+00> : vector<64x8xf32>
    %46 = tpu.matmul %44, %45, %cst_35 {dimension_numbers = #tpu.dot_dimension_numbers<[1], [0], [0], [1], [0, 0, 1, 1], [], []>} : vector<64x64xbf16>, vector<64x8xbf16>, vector<64x8xf32> -> vector<64x8xf32>
    %47 = tpu.concatenate %46, %46, %46, %46 in 1 : vector<64x8xf32>, vector<64x8xf32>, vector<64x8xf32>, vector<64x8xf32> -> vector<64x32xf32>
    %48 = arith.mulf %47, %3 : vector<64x32xf32>
    %49 = arith.truncf %48 : vector<64x32xf32> to vector<64x32xbf16>
    %cst_36 = arith.constant dense<0.000000e+00> : vector<16x32xf32>
    %50 = tpu.matmul %4, %49, %cst_36 {dimension_numbers = #tpu.dot_dimension_numbers<[1], [0], [0], [1], [0, 0, 1, 1], [], []>} : vector<16x64xbf16>, vector<64x32xbf16>, vector<16x32xf32> -> vector<16x32xf32>
    %51 = arith.truncf %50 : vector<16x32xf32> to vector<16x32xbf16>
    %c0_37 = arith.constant 0 : index
    %c0_38 = arith.constant 0 : index
    %c0_39 = arith.constant 0 : index
    %52 = vector.load %arg7[%c0_37, %c0_38, %c0_39] : memref<2x32x32xbf16, #tpu.memory_space<vmem>>, vector<1x32x32xbf16>
    %53 = vector.shape_cast %52 : vector<1x32x32xbf16> to vector<32x32xbf16>
    %cst_40 = arith.constant dense<0.000000e+00> : vector<16x32xf32>
    %54 = tpu.matmul %51, %53, %cst_40 {dimension_numbers = #tpu.dot_dimension_numbers<[1], [0], [0], [1], [0, 0, 1, 1], [], []>} : vector<16x32xbf16>, vector<32x32xbf16>, vector<16x32xf32> -> vector<16x32xf32>
    %c0_41 = arith.constant 0 : index
    %c0_42 = arith.constant 0 : index
    %c0_43 = arith.constant 0 : index
    %55 = vector.load %arg8[%c0_41, %c0_42, %c0_43] : memref<2x1x32xf32, #tpu.memory_space<vmem>>, vector<1x1x32xf32>
    %56 = vector.shape_cast %55 : vector<1x1x32xf32> to vector<1x32xf32>
    %57 = vector.broadcast %56 : vector<1x32xf32> to vector<16x32xf32>
    %58 = arith.addf %54, %57 : vector<16x32xf32>
    %59 = arith.addf %0, %58 : vector<16x32xf32>
    %cst_44 = arith.constant dense<0.000000e+00> : vector<16x32xf32>
    %60 = tpu.matmul %1, %59, %cst_44 {dimension_numbers = #tpu.dot_dimension_numbers<[1], [0], [0], [1], [0, 0, 1, 1], [], []>} : vector<16x16xf32>, vector<16x32xf32>, vector<16x32xf32> -> vector<16x32xf32>
    %61 = arith.truncf %60 : vector<16x32xf32> to vector<16x32xbf16>
    %c0_45 = arith.constant 0 : index
    %c0_46 = arith.constant 0 : index
    %c0_47 = arith.constant 0 : index
    %62 = vector.load %arg9[%c0_45, %c0_46, %c0_47] : memref<2x32x64xbf16, #tpu.memory_space<vmem>>, vector<1x32x64xbf16>
    %63 = vector.shape_cast %62 : vector<1x32x64xbf16> to vector<32x64xbf16>
    %cst_48 = arith.constant dense<0.000000e+00> : vector<16x64xf32>
    %64 = tpu.matmul %61, %63, %cst_48 {dimension_numbers = #tpu.dot_dimension_numbers<[1], [0], [0], [1], [0, 0, 1, 1], [], []>} : vector<16x32xbf16>, vector<32x64xbf16>, vector<16x64xf32> -> vector<16x64xf32>
    %cst_49 = arith.constant 0.000000e+00 : f32
    %65 = vector.broadcast %cst_49 : f32 to vector<16x64xf32>
    %66 = arith.maximumf %64, %65 : vector<16x64xf32>
    %67 = arith.truncf %66 : vector<16x64xf32> to vector<16x64xbf16>
    %c0_50 = arith.constant 0 : index
    %c0_51 = arith.constant 0 : index
    %c0_52 = arith.constant 0 : index
    %68 = vector.load %arg10[%c0_50, %c0_51, %c0_52] : memref<2x64x32xbf16, #tpu.memory_space<vmem>>, vector<1x64x32xbf16>
    %69 = vector.shape_cast %68 : vector<1x64x32xbf16> to vector<64x32xbf16>
    %cst_53 = arith.constant dense<0.000000e+00> : vector<16x32xf32>
    %70 = tpu.matmul %67, %69, %cst_53 {dimension_numbers = #tpu.dot_dimension_numbers<[1], [0], [0], [1], [0, 0, 1, 1], [], []>} : vector<16x64xbf16>, vector<64x32xbf16>, vector<16x32xf32> -> vector<16x32xf32>
    %71 = arith.addf %60, %70 : vector<16x32xf32>
    %cst_54 = arith.constant dense<0.000000e+00> : vector<16x32xf32>
    %72 = tpu.matmul %1, %71, %cst_54 {dimension_numbers = #tpu.dot_dimension_numbers<[1], [0], [0], [1], [0, 0, 1, 1], [], []>} : vector<16x16xf32>, vector<16x32xf32>, vector<16x32xf32> -> vector<16x32xf32>
    %73 = tpu.concatenate %72, %72, %72, %72 in 0 : vector<16x32xf32>, vector<16x32xf32>, vector<16x32xf32>, vector<16x32xf32> -> vector<64x32xf32>
    %74 = tpu.concatenate %73, %73, %73, %73 in 1 : vector<64x32xf32>, vector<64x32xf32>, vector<64x32xf32>, vector<64x32xf32> -> vector<64x128xf32>
    %75 = arith.mulf %74, %2 : vector<64x128xf32>
    %76 = arith.truncf %75 : vector<64x128xf32> to vector<64x128xbf16>
    %c1 = arith.constant 1 : index
    %c0_55 = arith.constant 0 : index
    %c0_56 = arith.constant 0 : index
    %77 = vector.load %arg1[%c1, %c0_55, %c0_56] : memref<2x128x8xbf16, #tpu.memory_space<vmem>>, vector<1x128x8xbf16>
    %78 = vector.shape_cast %77 : vector<1x128x8xbf16> to vector<128x8xbf16>
    %cst_57 = arith.constant dense<0.000000e+00> : vector<64x8xf32>
    %79 = tpu.matmul %76, %78, %cst_57 {dimension_numbers = #tpu.dot_dimension_numbers<[1], [0], [0], [1], [0, 0, 1, 1], [], []>} : vector<64x128xbf16>, vector<128x8xbf16>, vector<64x8xf32> -> vector<64x8xf32>
    %c1_58 = arith.constant 1 : index
    %c0_59 = arith.constant 0 : index
    %c0_60 = arith.constant 0 : index
    %80 = vector.load %arg4[%c1_58, %c0_59, %c0_60] : memref<2x64x8xf32, #tpu.memory_space<vmem>>, vector<1x64x8xf32>
    %81 = vector.shape_cast %80 : vector<1x64x8xf32> to vector<64x8xf32>
    %82 = arith.addf %79, %81 : vector<64x8xf32>
    %c1_61 = arith.constant 1 : index
    %c0_62 = arith.constant 0 : index
    %c0_63 = arith.constant 0 : index
    %83 = vector.load %arg2[%c1_61, %c0_62, %c0_63] : memref<2x128x8xbf16, #tpu.memory_space<vmem>>, vector<1x128x8xbf16>
    %84 = vector.shape_cast %83 : vector<1x128x8xbf16> to vector<128x8xbf16>
    %cst_64 = arith.constant dense<0.000000e+00> : vector<64x8xf32>
    %85 = tpu.matmul %76, %84, %cst_64 {dimension_numbers = #tpu.dot_dimension_numbers<[1], [0], [0], [1], [0, 0, 1, 1], [], []>} : vector<64x128xbf16>, vector<128x8xbf16>, vector<64x8xf32> -> vector<64x8xf32>
    %c1_65 = arith.constant 1 : index
    %c0_66 = arith.constant 0 : index
    %c0_67 = arith.constant 0 : index
    %86 = vector.load %arg5[%c1_65, %c0_66, %c0_67] : memref<2x64x8xf32, #tpu.memory_space<vmem>>, vector<1x64x8xf32>
    %87 = vector.shape_cast %86 : vector<1x64x8xf32> to vector<64x8xf32>
    %88 = arith.addf %85, %87 : vector<64x8xf32>
    %c1_68 = arith.constant 1 : index
    %c0_69 = arith.constant 0 : index
    %c0_70 = arith.constant 0 : index
    %89 = vector.load %arg3[%c1_68, %c0_69, %c0_70] : memref<2x128x8xbf16, #tpu.memory_space<vmem>>, vector<1x128x8xbf16>
    %90 = vector.shape_cast %89 : vector<1x128x8xbf16> to vector<128x8xbf16>
    %cst_71 = arith.constant dense<0.000000e+00> : vector<64x8xf32>
    %91 = tpu.matmul %76, %90, %cst_71 {dimension_numbers = #tpu.dot_dimension_numbers<[1], [0], [0], [1], [0, 0, 1, 1], [], []>} : vector<64x128xbf16>, vector<128x8xbf16>, vector<64x8xf32> -> vector<64x8xf32>
    %c1_72 = arith.constant 1 : index
    %c0_73 = arith.constant 0 : index
    %c0_74 = arith.constant 0 : index
    %92 = vector.load %arg6[%c1_72, %c0_73, %c0_74] : memref<2x64x8xf32, #tpu.memory_space<vmem>>, vector<1x64x8xf32>
    %93 = vector.shape_cast %92 : vector<1x64x8xf32> to vector<64x8xf32>
    %94 = arith.addf %91, %93 : vector<64x8xf32>
    %95 = arith.truncf %82 : vector<64x8xf32> to vector<64x8xbf16>
    %96 = arith.truncf %88 : vector<64x8xf32> to vector<64x8xbf16>
    %cst_75 = arith.constant dense<0.000000e+00> : vector<64x64xf32>
    %97 = tpu.matmul %95, %96, %cst_75 {dimension_numbers = #tpu.dot_dimension_numbers<[1], [1], [0], [0], [0, 0, 1, 0], [], []>} : vector<64x8xbf16>, vector<64x8xbf16>, vector<64x64xf32> -> vector<64x64xf32>
    %cst_76 = arith.constant 0.353553385 : f32
    %98 = vector.broadcast %cst_76 : f32 to vector<64x64xf32>
    %99 = arith.mulf %97, %98 : vector<64x64xf32>
    %100 = arith.addf %99, %5 : vector<64x64xf32>
    %cst_77 = arith.constant dense<0xFF800000> : vector<64xf32>
    %101 = vector.multi_reduction <maximumf>, %100, %cst_77 [1] : vector<64x64xf32> to vector<64xf32>
    %102 = vector.shape_cast %101 : vector<64xf32> to vector<64x1xf32>
    %103 = vector.broadcast %102 : vector<64x1xf32> to vector<64x64xf32>
    %104 = arith.subf %100, %103 : vector<64x64xf32>
    %105 = math.exp %104 : vector<64x64xf32>
    %cst_78 = arith.constant dense<0.000000e+00> : vector<64xf32>
    %106 = vector.multi_reduction <add>, %105, %cst_78 [1] : vector<64x64xf32> to vector<64xf32>
    %107 = vector.shape_cast %106 : vector<64xf32> to vector<64x1xf32>
    %108 = tpu.reciprocal %107 : vector<64x1xf32> -> vector<64x1xf32>
    %109 = vector.broadcast %108 : vector<64x1xf32> to vector<64x64xf32>
    %110 = arith.mulf %105, %109 : vector<64x64xf32>
    %111 = arith.truncf %110 : vector<64x64xf32> to vector<64x64xbf16>
    %112 = arith.truncf %94 : vector<64x8xf32> to vector<64x8xbf16>
    %cst_79 = arith.constant dense<0.000000e+00> : vector<64x8xf32>
    %113 = tpu.matmul %111, %112, %cst_79 {dimension_numbers = #tpu.dot_dimension_numbers<[1], [0], [0], [1], [0, 0, 1, 1], [], []>} : vector<64x64xbf16>, vector<64x8xbf16>, vector<64x8xf32> -> vector<64x8xf32>
    %114 = tpu.concatenate %113, %113, %113, %113 in 1 : vector<64x8xf32>, vector<64x8xf32>, vector<64x8xf32>, vector<64x8xf32> -> vector<64x32xf32>
    %115 = arith.mulf %114, %3 : vector<64x32xf32>
    %116 = arith.truncf %115 : vector<64x32xf32> to vector<64x32xbf16>
    %cst_80 = arith.constant dense<0.000000e+00> : vector<16x32xf32>
    %117 = tpu.matmul %4, %116, %cst_80 {dimension_numbers = #tpu.dot_dimension_numbers<[1], [0], [0], [1], [0, 0, 1, 1], [], []>} : vector<16x64xbf16>, vector<64x32xbf16>, vector<16x32xf32> -> vector<16x32xf32>
    %118 = arith.truncf %117 : vector<16x32xf32> to vector<16x32xbf16>
    %c1_81 = arith.constant 1 : index
    %c0_82 = arith.constant 0 : index
    %c0_83 = arith.constant 0 : index
    %119 = vector.load %arg7[%c1_81, %c0_82, %c0_83] : memref<2x32x32xbf16, #tpu.memory_space<vmem>>, vector<1x32x32xbf16>
    %120 = vector.shape_cast %119 : vector<1x32x32xbf16> to vector<32x32xbf16>
    %cst_84 = arith.constant dense<0.000000e+00> : vector<16x32xf32>
    %121 = tpu.matmul %118, %120, %cst_84 {dimension_numbers = #tpu.dot_dimension_numbers<[1], [0], [0], [1], [0, 0, 1, 1], [], []>} : vector<16x32xbf16>, vector<32x32xbf16>, vector<16x32xf32> -> vector<16x32xf32>
    %c1_85 = arith.constant 1 : index
    %c0_86 = arith.constant 0 : index
    %c0_87 = arith.constant 0 : index
    %122 = vector.load %arg8[%c1_85, %c0_86, %c0_87] : memref<2x1x32xf32, #tpu.memory_space<vmem>>, vector<1x1x32xf32>
    %123 = vector.shape_cast %122 : vector<1x1x32xf32> to vector<1x32xf32>
    %124 = vector.broadcast %123 : vector<1x32xf32> to vector<16x32xf32>
    %125 = arith.addf %121, %124 : vector<16x32xf32>
    %126 = arith.addf %72, %125 : vector<16x32xf32>
    %cst_88 = arith.constant dense<0.000000e+00> : vector<16x32xf32>
    %127 = tpu.matmul %1, %126, %cst_88 {dimension_numbers = #tpu.dot_dimension_numbers<[1], [0], [0], [1], [0, 0, 1, 1], [], []>} : vector<16x16xf32>, vector<16x32xf32>, vector<16x32xf32> -> vector<16x32xf32>
    %128 = arith.truncf %127 : vector<16x32xf32> to vector<16x32xbf16>
    %c1_89 = arith.constant 1 : index
    %c0_90 = arith.constant 0 : index
    %c0_91 = arith.constant 0 : index
    %129 = vector.load %arg9[%c1_89, %c0_90, %c0_91] : memref<2x32x64xbf16, #tpu.memory_space<vmem>>, vector<1x32x64xbf16>
    %130 = vector.shape_cast %129 : vector<1x32x64xbf16> to vector<32x64xbf16>
    %cst_92 = arith.constant dense<0.000000e+00> : vector<16x64xf32>
    %131 = tpu.matmul %128, %130, %cst_92 {dimension_numbers = #tpu.dot_dimension_numbers<[1], [0], [0], [1], [0, 0, 1, 1], [], []>} : vector<16x32xbf16>, vector<32x64xbf16>, vector<16x64xf32> -> vector<16x64xf32>
    %cst_93 = arith.constant 0.000000e+00 : f32
    %132 = vector.broadcast %cst_93 : f32 to vector<16x64xf32>
    %133 = arith.maximumf %131, %132 : vector<16x64xf32>
    %134 = arith.truncf %133 : vector<16x64xf32> to vector<16x64xbf16>
    %c1_94 = arith.constant 1 : index
    %c0_95 = arith.constant 0 : index
    %c0_96 = arith.constant 0 : index
    %135 = vector.load %arg10[%c1_94, %c0_95, %c0_96] : memref<2x64x32xbf16, #tpu.memory_space<vmem>>, vector<1x64x32xbf16>
    %136 = vector.shape_cast %135 : vector<1x64x32xbf16> to vector<64x32xbf16>
    %cst_97 = arith.constant dense<0.000000e+00> : vector<16x32xf32>
    %137 = tpu.matmul %134, %136, %cst_97 {dimension_numbers = #tpu.dot_dimension_numbers<[1], [0], [0], [1], [0, 0, 1, 1], [], []>} : vector<16x64xbf16>, vector<64x32xbf16>, vector<16x32xf32> -> vector<16x32xf32>
    %138 = arith.addf %127, %137 : vector<16x32xf32>
    %cst_98 = arith.constant dense<0.000000e+00> : vector<16x32xf32>
    %139 = tpu.matmul %1, %138, %cst_98 {dimension_numbers = #tpu.dot_dimension_numbers<[1], [0], [0], [1], [0, 0, 1, 1], [], []>} : vector<16x16xf32>, vector<16x32xf32>, vector<16x32xf32> -> vector<16x32xf32>
    %cst_99 = arith.constant dense<0.000000e+00> : vector<16xf32>
    %140 = vector.multi_reduction <add>, %139, %cst_99 [1] : vector<16x32xf32> to vector<16xf32>
    %141 = vector.shape_cast %140 : vector<16xf32> to vector<16x1xf32>
    %cst_100 = arith.constant 3.200000e+01 : f32
    %142 = vector.broadcast %cst_100 : f32 to vector<16x1xf32>
    %143 = arith.divf %141, %142 : vector<16x1xf32>
    %144 = vector.broadcast %143 : vector<16x1xf32> to vector<16x32xf32>
    %145 = arith.subf %139, %144 : vector<16x32xf32>
    %146 = arith.mulf %145, %145 : vector<16x32xf32>
    %cst_101 = arith.constant dense<0.000000e+00> : vector<16xf32>
    %147 = vector.multi_reduction <add>, %146, %cst_101 [1] : vector<16x32xf32> to vector<16xf32>
    %148 = vector.shape_cast %147 : vector<16xf32> to vector<16x1xf32>
    %cst_102 = arith.constant 3.200000e+01 : f32
    %149 = vector.broadcast %cst_102 : f32 to vector<16x1xf32>
    %150 = arith.divf %148, %149 : vector<16x1xf32>
    %151 = vector.broadcast %143 : vector<16x1xf32> to vector<16x32xf32>
    %152 = arith.subf %139, %151 : vector<16x32xf32>
    %cst_103 = arith.constant 9.99999974E-6 : f32
    %153 = vector.broadcast %cst_103 : f32 to vector<16x1xf32>
    %154 = arith.addf %150, %153 : vector<16x1xf32>
    %155 = math.rsqrt %154 : vector<16x1xf32>
    %156 = vector.broadcast %155 : vector<16x1xf32> to vector<16x32xf32>
    %157 = arith.mulf %152, %156 : vector<16x32xf32>
    %c0_104 = arith.constant 0 : index
    %c0_105 = arith.constant 0 : index
    %158 = vector.load %arg17[%c0_104, %c0_105] : memref<1x32xf32, #tpu.memory_space<vmem>>, vector<1x32xf32>
    %159 = vector.broadcast %158 : vector<1x32xf32> to vector<16x32xf32>
    %160 = arith.mulf %157, %159 : vector<16x32xf32>
    %c0_106 = arith.constant 0 : index
    %c0_107 = arith.constant 0 : index
    %161 = vector.load %arg18[%c0_106, %c0_107] : memref<1x32xf32, #tpu.memory_space<vmem>>, vector<1x32xf32>
    %162 = vector.broadcast %161 : vector<1x32xf32> to vector<16x32xf32>
    %163 = arith.addf %160, %162 : vector<16x32xf32>
    %c0_108 = arith.constant 0 : index
    %c0_109 = arith.constant 0 : index
    %164 = vector.load %arg12[%c0_108, %c0_109] : memref<16x16xf32, #tpu.memory_space<vmem>>, vector<16x16xf32>
    %cst_110 = arith.constant dense<0.000000e+00> : vector<16x32xf32>
    %165 = tpu.matmul %164, %163, %cst_110 {dimension_numbers = #tpu.dot_dimension_numbers<[1], [0], [0], [1], [0, 0, 1, 1], [], []>} : vector<16x16xf32>, vector<16x32xf32>, vector<16x32xf32> -> vector<16x32xf32>
    %c0_111 = arith.constant 0 : index
    %c0_112 = arith.constant 0 : index
    %166 = vector.load %arg19[%c0_111, %c0_112] : memref<16x32xf32, #tpu.memory_space<vmem>>, vector<16x32xf32>
    tpu.vector_store %arg19[%c0_111, %c0_112], %165 {strides = array<i32>} : memref<16x32xf32, #tpu.memory_space<vmem>>, vector<16x32xf32>,
    %167 = tpu.concatenate %43, %110 in 1 : vector<64x64xf32>, vector<64x64xf32> -> vector<64x128xf32>
    %c0_113 = arith.constant 0 : index
    %c0_114 = arith.constant 0 : index
    %168 = vector.load %arg20[%c0_113, %c0_114] : memref<64x128xf32, #tpu.memory_space<vmem>>, vector<64x128xf32>
    tpu.vector_store %arg20[%c0_113, %c0_114], %167 {strides = array<i32>} : memref<64x128xf32, #tpu.memory_space<vmem>>, vector<64x128xf32>,
    return
  }
}

</mosaic_0001>

<bundles_post_ra>
// kernel: encoder_forward.1
= control target key start
LH: loop header
LB: loop body
LE: loop exit
PB: predicated region body
PF: predicated region fallthrough
CT: control target
= control target key end

     0   :  { %s4838_s0 = inlined_call_operand.vmem [shape: f32[16,32], index: 0, kind: input, shape index: {}]   ;;  %s4839_s1 = inlined_call_operand.vmem [shape: bf16[2,128,8], index: 1, kind: input, shape index: {}]   ;;  %s4840_s2 = inlined_call_operand.vmem [shape: bf16[2,128,8], index: 2, kind: input, shape index: {}]   ;;  %s4841_s3 = inlined_call_operand.vmem [shape: bf16[2,128,8], index: 3, kind: input, shape index: {}]   ;;  %s4842_s4 = inlined_call_operand.vmem [shape: f32[2,64,8], index: 4, kind: input, shape index: {}]   ;;  %s4843_s5 = inlined_call_operand.vmem [shape: f32[2,64,8], index: 5, kind: input, shape index: {}]   ;;  %s4844_s6 = inlined_call_operand.vmem [shape: f32[2,64,8], index: 6, kind: input, shape index: {}]   ;;  %s4845_s7 = inlined_call_operand.vmem [shape: bf16[2,32,32], index: 7, kind: input, shape index: {}]   ;;  %s4846_s8 = inlined_call_operand.vmem [shape: f32[2,1,32], index: 8, kind: input, shape index: {}]   ;;  %s4847_s9 = inlined_call_operand.vmem [shape: bf16[2,32,64], index: 9, kind: input, shape index: {}]   ;;  %s4848_s10 = inlined_call_operand.vmem [shape: bf16[2,64,32], index: 10, kind: input, shape index: {}]   ;;  %s4849_s11 = inlined_call_operand.vmem [shape: f32[16,16], index: 11, kind: input, shape index: {}]   ;;  %s4850_s12 = inlined_call_operand.vmem [shape: f32[16,16], index: 12, kind: input, shape index: {}]   ;;  %s4851_s13 = inlined_call_operand.vmem [shape: f32[64,128], index: 13, kind: input, shape index: {}]   ;;  %s4852_s14 = inlined_call_operand.vmem [shape: f32[64,32], index: 14, kind: input, shape index: {}]   ;;  %s4853_s15 = inlined_call_operand.vmem [shape: bf16[16,64], index: 15, kind: input, shape index: {}]   ;;  %s4854_s16 = inlined_call_operand.vmem [shape: f32[64,64], index: 16, kind: input, shape index: {}]   ;;  %s4855_s17 = inlined_call_operand.vmem [shape: f32[1,32], index: 17, kind: input, shape index: {}]   ;;  %s4856_s18 = inlined_call_operand.vmem [shape: f32[1,32], index: 18, kind: input, shape index: {}]   ;;  %s4857_s19 = inlined_call_operand.hbm [shape: f32[16,32], index: 19, kind: output, shape index: {0}]   ;;  %s4858_s20 = inlined_call_operand.vmem [shape: f32[64,128], index: 20, kind: output, shape index: {1}]  }
   0x1   :  { %4870 = sst [smem:[#allocation5_spill]] %s4838_s0 }
   0x2   :  { %4871 = sst [smem:[#allocation6_spill]] %s4839_s1 }
   0x3   :  { %4872 = sst [smem:[#allocation7_spill]] %s4840_s2 }
   0x4   :  { %4873 = sst [smem:[#allocation8_spill]] %s4841_s3 }
   0x5   :  { %4874 = sst [smem:[#allocation9_spill]] %s4842_s4 }
   0x6   :  { %s4875_s23 = sld [smem:[#allocation5_spill]]  ;;  %s4866_s25 = smov 64  }
   0x7   :  { %s4868_s3 = smov 32   ;;  %s4876_s28 = sld [smem:[#allocation6_spill]] }
   0x8   :  { %s4877_s30 = sld [smem:[#allocation7_spill]]  ;;  %s4864_s4 = smov 96  }
   0x9   :  { %s4878_s22 = sld [smem:[#allocation8_spill]] }
   0xc   :  { %v3845_v0 = vld [vmem:[%s4875_s23] sm:$0xff]  ;;  %v3850_v1 = vld [vmem:[%s4875_s23 + $0x8] sm:$0xff] }
   0xd   :  { %104 = vrot.lane.b32.xlu1 %v3845_v0, %s4866_s25  ;;  %98 = vrot.lane.b32.xlu0 %v3845_v0, %s4868_s3  ;;  %v3541_v2 = vld [vmem:[%s4876_s28] sm:$0xff]   ;;  %v3543_v4 = vld [vmem:[%s4876_s28 + $0x8] sm:$0xff]  }
   0xe   :  { %v3542_v3 = vld [vmem:[%s4877_s30] sm:$0xff]   ;;  %3180 = vmatprep.subr.bf16.mxu0 %v3541_v2  ;;  %v3544_v5 = vld [vmem:[%s4877_s30 + $0x8] sm:$0xff]   ;;  %v3545_v6 = vld [vmem:[%s4876_s28 + $0x10] sm:$0xff]  }
   0xf   :  { %3181 = vmatpush3.bf16.msra.mxu0 %v3541_v2  ;;  %3204 = vmatprep.subr.bf16.mxu1 %v3542_v3  ;;  %v3546_v7 = vld [vmem:[%s4877_s30 + $0x10] sm:$0xff]   ;;  %v3547_v8 = vld [vmem:[%s4876_s28 + $0x18] sm:$0xff]   ;;  %v3549_v10 = vld [vmem:[%s4876_s28 + $0x20] sm:$0xff]  }
  0x10   :  { %3205 = vmatpush3.bf16.msra.mxu1 %v3542_v3  ;;  %3182 = vmatprep.subr.bf16.mxu0 %v3543_v4  ;;  %v3548_v9 = vld [vmem:[%s4877_s30 + $0x18] sm:$0xff]   ;;  %v3550_v11 = vld [vmem:[%s4877_s30 + $0x20] sm:$0xff]   ;;  %v3551_v12 = vld [vmem:[%s4876_s28 + $0x28] sm:$0xff]  }
  0x11   :  { %106 = vrot.lane.b32.xlu1 %v3850_v1, %s4866_s25  ;;  %100 = vrot.lane.b32.xlu0 %v3850_v1, %s4868_s3  ;;  %v3552_v13 = vld [vmem:[%s4877_s30 + $0x28] sm:$0xff]   ;;  %v3553_v14 = vld [vmem:[%s4876_s28 + $0x30] sm:$0xff]  }
  0x12   :  { %3206 = vmatprep.subr.bf16.mxu1 %v3544_v5  ;;  %v3554_v15 = vld [vmem:[%s4877_s30 + $0x30] sm:$0xff]   ;;  %v3555_v16 = vld [vmem:[%s4876_s28 + $0x38] sm:$0xff]   ;;  %v3557_v18 = vld [vmem:[%s4878_s22] sm:$0xff]  }
  0x13   :  { %3183 = vmatpush3.bf16.msra.mxu0 %v3543_v4  ;;  %v3556_v17 = vld [vmem:[%s4877_s30 + $0x38] sm:$0xff]  }
  0x14   :  { %3207 = vmatpush3.bf16.msra.mxu1 %v3544_v5  ;;  %3184 = vmatprep.subr.bf16.mxu0 %v3545_v6 }
  0x15   :  { %112 = vrot.lane.b32.xlu1 %v3850_v1, %s4864_s4  ;;  %110 = vrot.lane.b32.xlu0 %v3845_v0, %s4864_s4 }
  0x16   :  { %3208 = vmatprep.subr.bf16.mxu1 %v3546_v7 }
  0x17   :  { %3185 = vmatpush3.bf16.msra.mxu0 %v3545_v6 }
  0x18   :  { %3186 = vmatprep.subr.bf16.mxu0 %v3547_v8  ;;  %3209 = vmatpush3.bf16.msra.mxu1 %v3546_v7 }
  0x19   :  { %3210 = vmatprep.subr.bf16.mxu1 %v3548_v9 }
  0x1b   :  { %3187 = vmatpush3.bf16.msra.mxu0 %v3547_v8 }
  0x1c   :  { %3188 = vmatprep.subr.bf16.mxu0 %v3549_v10  ;;  %3211 = vmatpush3.bf16.msra.mxu1 %v3548_v9 }
  0x1d   :  { %3212 = vmatprep.subr.bf16.mxu1 %v3550_v11 }
  0x1f   :  { %3189 = vmatpush3.bf16.msra.mxu0 %v3549_v10 }
  0x20   :  { %3190 = vmatprep.subr.bf16.mxu0 %v3551_v12  ;;  %3213 = vmatpush3.bf16.msra.mxu1 %v3550_v11 }
  0x21   :  { %3214 = vmatprep.subr.bf16.mxu1 %v3552_v13 }
  0x23   :  { %3191 = vmatpush3.bf16.msra.mxu0 %v3551_v12 }
  0x24   :  { %3192 = vmatprep.subr.bf16.mxu0 %v3553_v14  ;;  %3215 = vmatpush3.bf16.msra.mxu1 %v3552_v13 }
  0x25   :  { %3216 = vmatprep.subr.bf16.mxu1 %v3554_v15 }
  0x27   :  { %3193 = vmatpush3.bf16.msra.mxu0 %v3553_v14 }
  0x28   :  { %3194 = vmatprep.subr.bf16.mxu0 %v3555_v16  ;;  %3217 = vmatpush3.bf16.msra.mxu1 %v3554_v15 }
  0x29   :  { %3218 = vmatprep.subr.bf16.mxu1 %v3556_v17 }
  0x2b   :  { %3195 = vmatpush3.bf16.msra.mxu0 %v3555_v16 }
  0x2c   :  { %3228 = vmatprep.subr.bf16.mxu0 %v3557_v18  ;;  %3219 = vmatpush3.bf16.msra.mxu1 %v3556_v17 }
  0x2d   :  { %26 = vsyncpa [#allocation3], 0  ;;  %vm116_vm0 = vcmask 261120   ;;  %vm119_vm1 = vcmask 523264   ;;  %vm122_vm2 = vcmask 785408   ;;  %v71_v25 = vld [vmem:[%s4851_s13 + $0x8] sm:$0xff] }
  0x2e   :  { %v73_v26 = vld [vmem:[%s4851_s13 + $0x18] sm:$0xff]  ;;  %v75_v27 = vld [vmem:[%s4851_s13 + $0x28] sm:$0xff]  ;;  %v70_v30 = vld [vmem:[%s4851_s13] sm:$0xff]  ;;  %s4879_s25 = sld [smem:[#allocation9_spill]]  ;;  %vm556_vm3 = vcmask 64512   ;;  %s3730_s27 = smov 8  }
  0x2f   :  { %v72_v31 = vld [vmem:[%s4851_s13 + $0x10] sm:$0xff]  ;;  %v74_v32 = vld [vmem:[%s4851_s13 + $0x20] sm:$0xff]  ;;  %v3558_v45 = vld [vmem:[%s4878_s22 + $0x8] sm:$0xff]   ;;  %s3731_s29 = smov 16   ;;  %s3732_s3 = smov 24   ;;  %vm3734_vm4 = vmmov 0  }
  0x30   :  { %v77_v46 = vld [vmem:[%s4851_s13 + $0x38] sm:$0xff]  ;;  %v76_v47 = vld [vmem:[%s4851_s13 + $0x30] sm:$0xff]  ;;  %v3561_v54 = vld [vmem:[%s4878_s22 + $0x20] sm:$0xff]   ;;  %vm923_vm5 = vcmask 130048   ;;  %vm932_vm6 = vcmask 195584  }
  0x31   :  { %v3559_v51 = vld [vmem:[%s4878_s22 + $0x10] sm:$0xff]   ;;  %v3560_v53 = vld [vmem:[%s4878_s22 + $0x18] sm:$0xff]   ;;  %v3562_v55 = vld [vmem:[%s4878_s22 + $0x28] sm:$0xff]  }
  0x32   :  { %v3563_v56 = vld [vmem:[%s4878_s22 + $0x30] sm:$0xff]   ;;  %v3564_v57 = vld [vmem:[%s4878_s22 + $0x38] sm:$0xff]   ;;  %v290_v3 = vld [vmem:[%s4843_s5] sm:$0xff] }
  0x33   :  { %v292_v59 = vld [vmem:[%s4843_s5 + $0x10] sm:$0xff]  ;;  %v291_v5 = vld [vmem:[%s4843_s5 + $0x8] sm:$0xff] }
  0x34   :  { %v155_v58 = vld [vmem:[%s4879_s25 + $0x10] sm:$0xff]  ;;  %v153_v62 = vld [vmem:[%s4879_s25] sm:$0xff]  ;;  %v156_v63 = vld [vmem:[%s4879_s25 + $0x18] sm:$0xff] }
  0x35   :  { %v154_v4 = vld [vmem:[%s4879_s25 + $0x8] sm:$0xff] }
  0x7f   :  { %v105_v19 = vpop.permute.xlu1 %104  ;;  %v99_v20 = vpop.permute.xlu0 %98 }
  0x80   :  { %v117_v23 = vsel %vm116_vm0, %v3845_v0, %v99_v20  ;;  %v293_v0 = vld [vmem:[%s4843_s5 + $0x18] sm:$0xff] }
  0x81   :  { %v120_v33 = vsel %vm119_vm1, %v117_v23, %v105_v19  ;;  %v296_v23 = vld [vmem:[%s4843_s5 + $0x30] sm:$0xff] }
  0x83   :  { %v107_v21 = vpop.permute.xlu1 %106  ;;  %v101_v22 = vpop.permute.xlu0 %100 }
  0x84   :  { %v118_v24 = vsel %vm116_vm0, %v3850_v1, %v101_v22  ;;  %v159_v22 = vld [vmem:[%s4879_s25 + $0x30] sm:$0xff] }
  0x85   :  { %v121_v29 = vsel %vm119_vm1, %v118_v24, %v107_v21 }
  0x87   :  { %v113_v28 = vpop.permute.xlu1 %112  ;;  %v111_v34 = vpop.permute.xlu0 %110 }
  0x88   :  { %v124_v35 = vsel %vm122_vm2, %v121_v29, %v113_v28  ;;  %v123_v36 = vsel %vm122_vm2, %v120_v33, %v111_v34  ;;  %v160_v28 = vld [vmem:[%s4879_s25 + $0x38] sm:$0xff]  ;;  %v158_v33 = vld [vmem:[%s4879_s25 + $0x28] sm:$0xff] }
  0x89   :  { %v126_v37 = vmul.f32 %v124_v35, %v71_v25  ;;  %v128_v38 = vmul.f32 %v124_v35, %v73_v26  ;;  %v130_v39 = vmul.f32 %v124_v35, %v75_v27  ;;  %v125_v40 = vmul.f32 %v123_v36, %v70_v30  ;;  %v157_v26 = vld [vmem:[%s4879_s25 + $0x20] sm:$0xff]  ;;  %v297_v29 = vld [vmem:[%s4843_s5 + $0x38] sm:$0xff]  ;;  %v295_v34 = vld [vmem:[%s4843_s5 + $0x28] sm:$0xff] }
  0x8a   :  { %v127_v41 = vmul.f32 %v123_v36, %v72_v31  ;;  %v129_v42 = vmul.f32 %v123_v36, %v74_v32  ;;  %v132_v49 = vmul.f32 %v124_v35, %v77_v46  ;;  %v131_v50 = vmul.f32 %v123_v36, %v76_v47  ;;  %v294_v32 = vld [vmem:[%s4843_s5 + $0x20] sm:$0xff] }
  0x8b   :  { %v133_v43 = vpack.c.bf16 %v126_v37, %v125_v40 }
  0x8c   :  { %v134_v44 = vpack.c.bf16 %v128_v38, %v127_v41  ;;  %v135_v48 = vpack.c.bf16 %v130_v39, %v129_v42  ;;  %v136_v52 = vpack.c.bf16 %v132_v49, %v131_v50 }
  0x8d   :  { %3196 = vmatprep.mubr.bf16.mxu0 %v133_v43  ;;  %3220 = vmatprep.mubr.bf16.mxu1 %v133_v43 }
  0x8e   :  { %3197 = vmatmul.mubr.bf16.vlgmr.msra.gmra.mrb[0].mxu0 %v134_v44  ;;  %3221 = vmatmul.mubr.bf16.vlgmr.msra.gmra.mrb[0].mxu1 %v134_v44 }
  0x8f   :  { %3229 = vmatpush3.bf16.msra.mxu0 %v3557_v18  ;;  %3200 = vmatprep.mubr.bf16.mxu0 %v135_v48 }
  0x90   :  { %3224 = vmatprep.mubr.bf16.mxu1 %v135_v48  ;;  %3230 = vmatprep.subr.bf16.mxu0 %v3558_v45 }
  0x93   :  { %3231 = vmatpush3.bf16.msra.mxu0 %v3558_v45 }
  0x94   :  { %3232 = vmatprep.subr.bf16.mxu0 %v3559_v51 }
  0x96   :  { %3201 = vmatmul.mubr.bf16.gmra.mrb[4].mxu0 %v136_v52  ;;  %3225 = vmatmul.mubr.bf16.gmra.mrb[4].mxu1 %v136_v52 }
  0x97   :  { %3233 = vmatpush3.bf16.msra.mxu0 %v3559_v51  ;;  %3244 = vmatprep.mubr.bf16.mxu0 %v133_v43 }
  0x98   :  { %3234 = vmatprep.subr.bf16.mxu0 %v3560_v53 }
  0x9b   :  { %3235 = vmatpush3.bf16.msra.mxu0 %v3560_v53  ;;  %v429_v53 = vld [vmem:[%s4844_s6 + $0x10] sm:$0xff] }
  0x9c   :  { %3236 = vmatprep.subr.bf16.mxu0 %v3561_v54 }
  0x9f   :  { %3237 = vmatpush3.bf16.msra.mxu0 %v3561_v54 }
  0xa0   :  { %3238 = vmatprep.subr.bf16.mxu0 %v3562_v55 }
  0xa3   :  { %3239 = vmatpush3.bf16.msra.mxu0 %v3562_v55  ;;  %v430_v55 = vld [vmem:[%s4844_s6 + $0x18] sm:$0xff] }
  0xa4   :  { %3240 = vmatprep.subr.bf16.mxu0 %v3563_v56 }
  0xa7   :  { %3241 = vmatpush3.bf16.msra.mxu0 %v3563_v56 }
  0xa8   :  { %3242 = vmatprep.subr.bf16.mxu0 %v3564_v57 }
  0xab   :  { %3243 = vmatpush3.bf16.msra.mxu0 %v3564_v57 }
  0xae   :  { %3245 = vmatmul.mubr.bf16.vlgmr.msra.gmra.mrb[8].mxu0 %v134_v44 }
  0xaf   :  { %3248 = vmatprep.mubr.bf16.mxu0 %v135_v48 }
  0xb6   :  { %3249 = vmatmul.mubr.bf16.gmra.mrb[12].mxu0 %v136_v52 }
 0x161   :  { %v3198_v60 = vpop.f32.mrb[0].mxu0  ;;  %v3222_v61 = vpop.f32.mrb[0].mxu1 }
 0x162   :  { %v243_v1 = vpop.f32.mrb[1].mxu0  ;;  %v380_v2 = vpop.f32.mrb[1].mxu1  ;;  %v3992_v8 = vadd.f32 %v3198_v60, %v155_v58  ;;  %v389_v9 = vadd.f32 %v3222_v61, %v292_v59  ;;  %v427_v58 = vld [vmem:[%s4844_s6] sm:$0xff]  ;;  %v428_v59 = vld [vmem:[%s4844_s6 + $0x8] sm:$0xff] }
 0x163   :  { %v3199_v6 = vpop.f32.mrb[2].mxu0  ;;  %v3223_v7 = vpop.f32.mrb[2].mxu1  ;;  %v244_v14 = vadd.f32 %v243_v1, %v153_v62  ;;  %v381_v15 = vadd.f32 %v380_v2, %v290_v3 }
 0x164   :  { %v3994_v10 = vadd.f32 %v3199_v6, %v156_v63  ;;  %v392_v11 = vadd.f32 %v3223_v7, %v293_v0  ;;  %v246_v12 = vpop.f32.mrb[3].mxu0  ;;  %v383_v13 = vpop.f32.mrb[3].mxu1  ;;  %v434_v6 = vld [vmem:[%s4844_s6 + $0x38] sm:$0xff] }
 0x165   :  { %v247_v16 = vadd.f32 %v246_v12, %v154_v4  ;;  %v384_v17 = vadd.f32 %v383_v13, %v291_v5  ;;  %v433_v4 = vld [vmem:[%s4844_s6 + $0x30] sm:$0xff] }
 0x166   :  { %v549_v18 = vpack.c.bf16 %v3994_v10, %v3992_v8  ;;  %v553_v19 = vpack.c.bf16 %v392_v11, %v389_v9  ;;  %v431_v9 = vld [vmem:[%s4844_s6 + $0x20] sm:$0xff]  ;;  %v432_v11 = vld [vmem:[%s4844_s6 + $0x28] sm:$0xff] }
 0x167   :  { %v548_v20 = vpack.c.bf16 %v247_v16, %v244_v14  ;;  %v552_v21 = vpack.c.bf16 %v384_v17, %v381_v15 }
 0x168   :  { %v573_v51 = vsel %vm556_vm3, %v553_v19, 0 }
 0x169   :  { %v3202_v24 = vpop.f32.mrb[4].mxu0  ;;  %v3226_v25 = vpop.f32.mrb[4].mxu1  ;;  %3523 = vmatprep.subr.msk.bf16.mxu1 %vm556_vm3, %v552_v21  ;;  %3260 = vmatprep.mubr.msk.bf16.mxu1 %vm556_vm3, %v548_v20  ;;  %v570_v27 = vsel %vm556_vm3, %v552_v21, 0  ;;  %v88_v20 = vld [vmem:[%s4854_s16] sm:$0xff] }
 0x16a   :  { %v259_v30 = vpop.f32.mrb[5].mxu0  ;;  %v396_v31 = vpop.f32.mrb[5].mxu1  ;;  %3253 = vmatpush3.bf16.xpose.msra.mxu1 %v570_v27  ;;  %v268_v37 = vadd.f32 %v3202_v24, %v159_v22  ;;  %v405_v38 = vadd.f32 %v3226_v25, %v296_v23  ;;  %v89_v25 = vld [vmem:[%s4854_s16 + $0x8] sm:$0xff] }
 0x16b   :  { %v3203_v35 = vpop.f32.mrb[6].mxu0  ;;  %v3227_v36 = vpop.f32.mrb[6].mxu1  ;;  %3524 = vmatprep.subr.msk.bf16.mxu1 %vm556_vm3, %v553_v19  ;;  %v260_v43 = vadd.f32 %v259_v30, %v157_v26  ;;  %v397_v44 = vadd.f32 %v396_v31, %v294_v32  ;;  %v90_v26 = vld [vmem:[%s4854_s16 + $0x10] sm:$0xff] }
 0x16c   :  { %v271_v39 = vadd.f32 %v3203_v35, %v160_v28  ;;  %v408_v40 = vadd.f32 %v3227_v36, %v297_v29  ;;  %v262_v41 = vpop.f32.mrb[7].mxu0  ;;  %v399_v42 = vpop.f32.mrb[7].mxu1 }
 0x16d   :  { %v263_v45 = vadd.f32 %v262_v41, %v158_v33  ;;  %v400_v46 = vadd.f32 %v399_v42, %v295_v34  ;;  %v91_v33 = vld [vmem:[%s4854_s16 + $0x18] sm:$0xff] }
 0x16e   :  { %v551_v47 = vpack.c.bf16 %v271_v39, %v268_v37  ;;  %v555_v48 = vpack.c.bf16 %v408_v40, %v405_v38  ;;  %v92_v38 = vld [vmem:[%s4854_s16 + $0x20] sm:$0xff] }
 0x16f   :  { %v550_v49 = vpack.c.bf16 %v263_v45, %v260_v43  ;;  %v554_v50 = vpack.c.bf16 %v400_v46, %v397_v44  ;;  %v94_v44 = vld [vmem:[%s4854_s16 + $0x30] sm:$0xff]  ;;  %v93_v45 = vld [vmem:[%s4854_s16 + $0x28] sm:$0xff] }
 0x170   :  { %v579_v56 = vsel %vm556_vm3, %v555_v48, 0 }
 0x171   :  { %v576_v52 = vsel %vm556_vm3, %v554_v50, 0 }
 0x172   :  { %3255 = vmatpush3.bf16.xpose.msra.mxu1 %v573_v51 }
 0x173   :  { %3525 = vmatprep.subr.msk.bf16.mxu1 %vm556_vm3, %v554_v50 }
 0x17a   :  { %3257 = vmatpush3.bf16.xpose.msra.mxu1 %v576_v52 }
 0x17b   :  { %3526 = vmatprep.subr.msk.bf16.mxu1 %vm556_vm3, %v555_v48 }
 0x181   :  { %v3246_v54 = vpop.f32.mrb[8].mxu0 }
 0x182   :  { %v517_v57 = vpop.f32.mrb[9].mxu0  ;;  %3259 = vmatpush3.bf16.xpose.msra.mxu1 %v579_v56  ;;  %v526_v61 = vadd.f32 %v3246_v54, %v429_v53  ;;  %v95_v53 = vld [vmem:[%s4854_s16 + $0x38] sm:$0xff] }
 0x183   :  { %v3247_v60 = vpop.f32.mrb[10].mxu0  ;;  %v518_v0 = vadd.f32 %v517_v57, %v427_v58 }
 0x184   :  { %v529_v62 = vadd.f32 %v3247_v60, %v430_v55  ;;  %v520_v63 = vpop.f32.mrb[11].mxu0 }
 0x185   :  { %v521_v1 = vadd.f32 %v520_v63, %v428_v59 }
 0x186   :  { %v755_v2 = vpack.c.bf16 %v529_v62, %v526_v61 }
 0x187   :  { %v754_v3 = vpack.c.bf16 %v521_v1, %v518_v0 }
 0x189   :  { %v3250_v5 = vpop.f32.mrb[12].mxu0  ;;  %3268 = vmatprep.subr.bf16.mxu0 %v754_v3  ;;  %3261 = vmatmul.mubr.msk.bf16.vlgmr.msra.gmra.mrb[8].mxu1 %vm556_vm3, %v549_v18 }
 0x18a   :  { %v533_v7 = vpop.f32.mrb[13].mxu0  ;;  %3269 = vmatpush3.bf16.msra.mxu0 %v754_v3  ;;  %3264 = vmatprep.mubr.msk.bf16.mxu1 %vm556_vm3, %v550_v49  ;;  %v542_v8 = vadd.f32 %v3250_v5, %v433_v4 }
 0x18b   :  { %v3251_v12 = vpop.f32.mrb[14].mxu0  ;;  %3270 = vmatprep.subr.bf16.mxu0 %v755_v2  ;;  %v534_v14 = vadd.f32 %v533_v7, %v431_v9 }
 0x18c   :  { %v545_v10 = vadd.f32 %v3251_v12, %v434_v6  ;;  %v536_v13 = vpop.f32.mrb[15].mxu0 }
 0x18d   :  { %v537_v15 = vadd.f32 %v536_v13, %v432_v11 }
 0x18e   :  { %v757_v16 = vpack.c.bf16 %v545_v10, %v542_v8  ;;  %3271 = vmatpush3.bf16.msra.mxu0 %v755_v2 }
 0x18f   :  { %v756_v17 = vpack.c.bf16 %v537_v15, %v534_v14 }
 0x191   :  { %3272 = vmatprep.subr.bf16.mxu0 %v756_v17  ;;  %3265 = vmatmul.mubr.msk.bf16.gmra.mrb[12].mxu1 %vm556_vm3, %v551_v47 }
 0x192   :  { %3273 = vmatpush3.bf16.msra.mxu0 %v756_v17 }
 0x193   :  { %3274 = vmatprep.subr.bf16.mxu0 %v757_v16 }
 0x196   :  { %3275 = vmatpush3.bf16.msra.mxu0 %v757_v16 }
 0x25c   :  { %v3262_v18 = vpop.f32.mrb[8].mxu1 }
 0x25d   :  { %v615_v19 = vpop.f32.mrb[9].mxu1  ;;  %v648_v21 = vmul.f32 0.35355338, %v3262_v18 }
 0x25e   :  { %v646_v22 = vmul.f32 0.35355338, %v615_v19  ;;  %v3263_v23 = vpop.f32.mrb[10].mxu1 }
 0x25f   :  { %v618_v24 = vpop.f32.mrb[11].mxu1  ;;  %v649_v29 = vmul.f32 0.35355338, %v3263_v23  ;;  %v656_v32 = vadd.f32 %v648_v21, %v90_v26 }
 0x260   :  { %v647_v27 = vmul.f32 0.35355338, %v618_v24  ;;  %v654_v28 = vadd.f32 %v646_v22, %v88_v20 }
 0x261   :  { %v657_v37 = vadd.f32 %v649_v29, %v91_v33  ;;  %v668_v42 = vsel %vm119_vm1, %v656_v32, -inf }
 0x262   :  { %v662_v30 = vsel %vm119_vm1, %v654_v28, -inf  ;;  %v655_v31 = vadd.f32 %v647_v27, %v89_v25 }
 0x263   :  { %663 = vmax.xlane.f32.xlu0 %v662_v30  ;;  %v671_v48 = vsel %vm119_vm1, %v657_v37, -inf }
 0x264   :  { %v3266_v34 = vpop.f32.mrb[12].mxu1  ;;  %v665_v35 = vsel %vm119_vm1, %v655_v31, -inf }
 0x265   :  { %666 = vmax.xlane.f32.xlu1 %v665_v35  ;;  %v631_v36 = vpop.f32.mrb[13].mxu1  ;;  %v652_v39 = vmul.f32 0.35355338, %v3266_v34 }
 0x266   :  { %v650_v40 = vmul.f32 0.35355338, %v631_v36  ;;  %v3267_v41 = vpop.f32.mrb[14].mxu1 }
 0x267   :  { %669 = vmax.xlane.f32.xlu0 %v668_v42  ;;  %v634_v43 = vpop.f32.mrb[15].mxu1  ;;  %v653_v49 = vmul.f32 0.35355338, %v3267_v41  ;;  %v660_v51 = vadd.f32 %v652_v39, %v94_v44 }
 0x268   :  { %v651_v46 = vmul.f32 0.35355338, %v634_v43  ;;  %v658_v47 = vadd.f32 %v650_v40, %v92_v38 }
 0x269   :  { %v680_v54 = vsel %vm119_vm1, %v660_v51, -inf  ;;  %v661_v56 = vadd.f32 %v653_v49, %v95_v53 }
 0x26a   :  { %v674_v50 = vsel %vm119_vm1, %v658_v47, -inf  ;;  %v659_v52 = vadd.f32 %v651_v46, %v93_v45 }
 0x26b   :  { %672 = vmax.xlane.f32.xlu0 %v671_v48  ;;  %675 = vmax.xlane.f32.xlu1 %v674_v50  ;;  %v683_v57 = vsel %vm119_vm1, %v661_v56, -inf }
 0x26c   :  { %v677_v55 = vsel %vm119_vm1, %v659_v52, -inf }
 0x26f   :  { %681 = vmax.xlane.f32.xlu1 %v680_v54  ;;  %678 = vmax.xlane.f32.xlu0 %v677_v55 }
 0x273   :  { %684 = vmax.xlane.f32.xlu0 %v683_v57 }
 0x2f0   :  { %v664_v58 = vpop.xlane.xlu0 %663 }
 0x2f1   :  { %v686_v59 = vsub.f32 %v654_v28, %v664_v58 }
 0x2f2   :  { %v667_v60 = vpop.xlane.xlu1 %666 }
 0x2f3   :  { %v694_v61 = vmul.f32 1.442695, %v686_v59  ;;  %v687_v62 = vsub.f32 %v655_v31, %v667_v60 }
 0x2f4   :  { %v670_v63 = vpop.xlane.xlu0 %669 }
 0x2f5   :  { %3606 = vpow2.f32 %v694_v61  ;;  %v696_v0 = vmul.f32 1.442695, %v687_v62  ;;  %v688_v1 = vsub.f32 %v656_v32, %v670_v63 }
 0x2f7   :  { %3608 = vpow2.f32 %v696_v0  ;;  %v698_v2 = vmul.f32 1.442695, %v688_v1 }
 0x2f8   :  { %v673_v3 = vpop.xlane.xlu0 %672  ;;  %v676_v4 = vpop.xlane.xlu1 %675 }
 0x2f9   :  { %3610 = vpow2.f32 %v698_v2  ;;  %v689_v5 = vsub.f32 %v657_v37, %v673_v3  ;;  %v690_v6 = vsub.f32 %v658_v47, %v676_v4 }
 0x2fb   :  { %v700_v7 = vmul.f32 1.442695, %v689_v5  ;;  %v702_v9 = vmul.f32 1.442695, %v690_v6  ;;  %v3733_v6 = vmov 0.0  }
 0x2fc   :  { %v682_v11 = vpop.xlane.xlu1 %681  ;;  %v679_v12 = vpop.xlane.xlu0 %678  ;;  %3284 = vmatprep.subr.bf16.mxu1 %v3733_v6  ;;  %3292 = vmatprep.mubr.msk.bf16.mxu1 %vm3734_vm4, %v3733_v6 }
 0x2fd   :  { %3612 = vpow2.f32 %v700_v7  ;;  %v692_v8 = vsub.f32 %v660_v51, %v682_v11  ;;  %v691_v10 = vsub.f32 %v659_v52, %v679_v12 }
 0x2fe   :  { %3614 = vpow2.f32 %v702_v9 }
 0x2ff   :  { %v3607_v13 = vpop.eup %3606  ;;  %v706_v14 = vmul.f32 1.442695, %v692_v8  ;;  %v704_v15 = vmul.f32 1.442695, %v691_v10 }
 0x300   :  { %v685_v16 = vpop.xlane.xlu0 %684  ;;  %v710_v17 = vsel %vm119_vm1, %v3607_v13, 0.0 }
 0x301   :  { %v3609_v18 = vpop.eup %3608  ;;  %3616 = vpow2.f32 %v706_v14  ;;  %v693_v19 = vsub.f32 %v661_v56, %v685_v16  ;;  %711 = vadd.xlane.f32.xlu1 %v710_v17  ;;  %v80_v17 = vld [vmem:[%s4852_s14 + $0x10] sm:$0xff] }
 0x302   :  { %3618 = vpow2.f32 %v704_v15  ;;  %v713_v20 = vsel %vm119_vm1, %v3609_v18, 0.0 }
 0x303   :  { %v3611_v21 = vpop.eup %3610  ;;  %v708_v22 = vmul.f32 1.442695, %v693_v19  ;;  %714 = vadd.xlane.f32.xlu0 %v713_v20 }
 0x304   :  { %v716_v23 = vsel %vm119_vm1, %v3611_v21, 0.0 }
 0x305   :  { %3620 = vpow2.f32 %v708_v22  ;;  %717 = vadd.xlane.f32.xlu1 %v716_v23 }
 0x307   :  { %v3613_v24 = vpop.eup %3612 }
 0x308   :  { %v3615_v25 = vpop.eup %3614  ;;  %v719_v26 = vsel %vm119_vm1, %v3613_v24, 0.0 }
 0x309   :  { %v722_v27 = vsel %vm119_vm1, %v3615_v25, 0.0  ;;  %720 = vadd.xlane.f32.xlu0 %v719_v26 }
 0x30a   :  { %723 = vadd.xlane.f32.xlu1 %v722_v27 }
 0x30b   :  { %v3617_v28 = vpop.eup %3616 }
 0x30c   :  { %v3619_v29 = vpop.eup %3618  ;;  %v728_v30 = vsel %vm119_vm1, %v3617_v28, 0.0 }
 0x30d   :  { %v725_v31 = vsel %vm119_vm1, %v3619_v29, 0.0 }
 0x30e   :  { %729 = vadd.xlane.f32.xlu1 %v728_v30  ;;  %726 = vadd.xlane.f32.xlu0 %v725_v31 }
 0x30f   :  { %v3621_v32 = vpop.eup %3620 }
 0x310   :  { %v731_v33 = vsel %vm119_vm1, %v3621_v32, 0.0 }
 0x312   :  { %732 = vadd.xlane.f32.xlu0 %v731_v33 }
 0x38e   :  { %v712_v34 = vpop.xlane.xlu1 %711 }
 0x38f   :  { %3622 = vrcp.f32 %v712_v34 }
 0x390   :  { %v715_v35 = vpop.xlane.xlu0 %714 }
 0x391   :  { %3624 = vrcp.f32 %v715_v35 }
 0x392   :  { %v718_v36 = vpop.xlane.xlu1 %717 }
 0x393   :  { %3626 = vrcp.f32 %v718_v36  ;;  %v79_v36 = vld [vmem:[%s4852_s14 + $0x8] sm:$0xff] }
 0x396   :  { %v721_v37 = vpop.xlane.xlu0 %720 }
 0x397   :  { %v724_v38 = vpop.xlane.xlu1 %723  ;;  %3628 = vrcp.f32 %v721_v37 }
 0x398   :  { %3630 = vrcp.f32 %v724_v38 }
 0x399   :  { %v3623_v39 = vpop.eup %3622 }
 0x39a   :  { %v4101_v43 = vmul.f32 %v3623_v39, %v3607_v13 }
 0x39b   :  { %v3625_v40 = vpop.eup %3624  ;;  %v730_v41 = vpop.xlane.xlu1 %729 }
 0x39c   :  { %v727_v42 = vpop.xlane.xlu0 %726  ;;  %v4103_v44 = vmul.f32 %v3625_v40, %v3609_v18 }
 0x39d   :  { %3632 = vrcp.f32 %v727_v42  ;;  %v3627_v46 = vpop.eup %3626 }
 0x39e   :  { %3634 = vrcp.f32 %v730_v41  ;;  %v750_v45 = vpack.c.bf16 %v4103_v44, %v4101_v43  ;;  %v4108_v49 = vmul.f32 %v3627_v46, %v3611_v21  ;;  %v81_v21 = vld [vmem:[%s4852_s14 + $0x18] sm:$0xff] }
 0x3a0   :  { %v733_v47 = vpop.xlane.xlu0 %732  ;;  %3276 = vmatprep.mubr.msk.bf16.mxu0 %vm119_vm1, %v750_v45 }
 0x3a1   :  { %3636 = vrcp.f32 %v733_v47  ;;  %v3629_v48 = vpop.eup %3628 }
 0x3a2   :  { %v4110_v50 = vmul.f32 %v3629_v48, %v3613_v24  ;;  %v3631_v52 = vpop.eup %3630 }
 0x3a3   :  { %v4115_v55 = vmul.f32 %v3631_v52, %v3615_v25 }
 0x3a4   :  { %v751_v51 = vpack.c.bf16 %v4110_v50, %v4108_v49 }
 0x3a6   :  { %3277 = vmatmul.mubr.msk.bf16.vlgmr.msra.gmra.mrb[16].mxu0 %vm119_vm1, %v751_v51 }
 0x3a7   :  { %v3633_v53 = vpop.eup %3632 }
 0x3a8   :  { %v3635_v54 = vpop.eup %3634  ;;  %v4117_v56 = vmul.f32 %v3633_v53, %v3619_v29 }
 0x3a9   :  { %v4121_v59 = vmul.f32 %v3635_v54, %v3617_v28 }
 0x3aa   :  { %v752_v58 = vpack.c.bf16 %v4117_v56, %v4115_v55 }
 0x3ab   :  { %v3637_v57 = vpop.eup %3636 }
 0x3ac   :  { %v4123_v60 = vmul.f32 %v3637_v57, %v3621_v32  ;;  %3280 = vmatprep.mubr.msk.bf16.mxu0 %vm119_vm1, %v752_v58  ;;  %v78_v32 = vld [vmem:[%s4852_s14] sm:$0xff] }
 0x3ad   :  { %v82_v58 = vld [vmem:[%s4852_s14 + $0x20] sm:$0xff] }
 0x3ae   :  { %v753_v61 = vpack.c.bf16 %v4123_v60, %v4121_v59 }
 0x3b0   :  { %3281 = vmatmul.mubr.msk.bf16.gmra.mrb[20].mxu0 %vm119_vm1, %v753_v61 }
 0x479   :  { %v3278_v62 = vpop.f32.mrb[16].mxu0 }
 0x47a   :  { %847 = vrot.lane.b32.xlu0 %v3278_v62, %s3730_s27  ;;  %v804_v63 = vpop.f32.mrb[17].mxu0 }
 0x47b   :  { %843 = vrot.lane.b32.xlu1 %v804_v63, %s3730_s27  ;;  %v3279_v0 = vpop.f32.mrb[18].mxu0 }
 0x47c   :  { %v4131_v1 = vpop.f32.mrb[19].mxu0 }
 0x47e   :  { %871 = vrot.lane.b32.xlu0 %v3278_v62, %s3731_s29 }
 0x47f   :  { %867 = vrot.lane.b32.xlu1 %v804_v63, %s3731_s29 }
 0x482   :  { %895 = vrot.lane.b32.xlu0 %v3278_v62, %s3732_s3 }
 0x483   :  { %v4135_v2 = vpop.f32.mrb[20].mxu0  ;;  %849 = vrot.lane.b32.xlu1 %v3279_v0, %s3730_s27 }
 0x484   :  { %v4138_v3 = vpop.f32.mrb[21].mxu0 }
 0x485   :  { %v4141_v4 = vpop.f32.mrb[22].mxu0 }
 0x486   :  { %v4143_v5 = vpop.f32.mrb[23].mxu0  ;;  %891 = vrot.lane.b32.xlu0 %v804_v63, %s3732_s3 }
 0x487   :  { %873 = vrot.lane.b32.xlu1 %v3279_v0, %s3731_s29 }
 0x48a   :  { %845 = vrot.lane.b32.xlu0 %v4131_v1, %s3730_s27 }
 0x48b   :  { %897 = vrot.lane.b32.xlu1 %v3279_v0, %s3732_s3 }
 0x48e   :  { %855 = vrot.lane.b32.xlu0 %v4135_v2, %s3730_s27 }
 0x48f   :  { %869 = vrot.lane.b32.xlu1 %v4131_v1, %s3731_s29 }
 0x492   :  { %879 = vrot.lane.b32.xlu0 %v4135_v2, %s3731_s29 }
 0x493   :  { %893 = vrot.lane.b32.xlu1 %v4131_v1, %s3732_s3 }
 0x496   :  { %851 = vrot.lane.b32.xlu0 %v4138_v3, %s3730_s27 }
 0x497   :  { %857 = vrot.lane.b32.xlu1 %v4141_v4, %s3730_s27 }
 0x49a   :  { %875 = vrot.lane.b32.xlu0 %v4138_v3, %s3731_s29 }
 0x49b   :  { %881 = vrot.lane.b32.xlu1 %v4141_v4, %s3731_s29 }
 0x49e   :  { %899 = vrot.lane.b32.xlu0 %v4138_v3, %s3732_s3 }
 0x49f   :  { %853 = vrot.lane.b32.xlu1 %v4143_v5, %s3730_s27 }
 0x4a2   :  { %903 = vrot.lane.b32.xlu0 %v4135_v2, %s3732_s3 }
 0x4a3   :  { %877 = vrot.lane.b32.xlu1 %v4143_v5, %s3731_s29 }
 0x4a7   :  { %901 = vrot.lane.b32.xlu1 %v4143_v5, %s3732_s3 }
 0x4ab   :  { %905 = vrot.lane.b32.xlu1 %v4141_v4, %s3732_s3 }
 0x4ec   :  { %v848_v7 = vpop.permute.xlu0 %847 }
 0x4ed   :  { %v844_v9 = vpop.permute.xlu1 %843  ;;  %v917_v15 = vsel %vm556_vm3, %v3278_v62, %v848_v7 }
 0x4ee   :  { %v915_v30 = vsel %vm556_vm3, %v804_v63, %v844_v9  ;;  %v83_v63 = vld [vmem:[%s4852_s14 + $0x28] sm:$0xff] }
 0x4f0   :  { %v872_v11 = vpop.permute.xlu0 %871 }
 0x4f1   :  { %v868_v12 = vpop.permute.xlu1 %867  ;;  %v926_v16 = vsel %vm923_vm5, %v917_v15, %v872_v11 }
 0x4f2   :  { %v924_v31 = vsel %vm923_vm5, %v915_v30, %v868_v12  ;;  %v2866_v30 = vld [vmem:[%s4846_s8] ss:$0 sm:$0xff] }
 0x4f4   :  { %v896_v8 = vpop.permute.xlu0 %895 }
 0x4f5   :  { %v850_v10 = vpop.permute.xlu1 %849  ;;  %v935_v18 = vsel %vm932_vm6, %v926_v16, %v896_v8 }
 0x4f6   :  { %v918_v19 = vsel %vm556_vm3, %v3279_v0, %v850_v10  ;;  %v943_v25 = vmul.f32 %v935_v18, %v80_v17  ;;  %v84_v10 = vld [vmem:[%s4852_s14 + $0x30] sm:$0xff] }
 0x4f8   :  { %v892_v13 = vpop.permute.xlu0 %891 }
 0x4f9   :  { %v874_v14 = vpop.permute.xlu1 %873  ;;  %v933_v33 = vsel %vm932_vm6, %v924_v31, %v892_v13 }
 0x4fa   :  { %v927_v22 = vsel %vm923_vm5, %v918_v19, %v874_v14  ;;  %v941_v40 = vmul.f32 %v933_v33, %v78_v32  ;;  %v85_v14 = vld [vmem:[%s4852_s14 + $0x38] sm:$0xff] }
 0x4fc   :  { %v846_v20 = vpop.permute.xlu0 %845 }
 0x4fd   :  { %v898_v23 = vpop.permute.xlu1 %897  ;;  %v916_v34 = vsel %vm556_vm3, %v4131_v1, %v846_v20  ;;  %v3565_v20 = vld [vmem:[%s4853_s15] sm:$0xff]  }
 0x4fe   :  { %v936_v24 = vsel %vm932_vm6, %v927_v22, %v898_v23  ;;  %v3567_v22 = vld [vmem:[%s4845_s7 + $0x8] sm:$0xff]  }
 0x4ff   :  { %v944_v26 = vmul.f32 %v936_v24, %v81_v21  ;;  %v3566_v21 = vld [vmem:[%s4845_s7] sm:$0xff]  }
 0x500   :  { %v856_v27 = vpop.permute.xlu0 %855 }
 0x501   :  { %v950_v28 = vpack.c.bf16 %v944_v26, %v943_v25  ;;  %v870_v29 = vpop.permute.xlu1 %869 }
 0x502   :  { %v925_v37 = vsel %vm923_vm5, %v916_v34, %v870_v29  ;;  %v3568_v29 = vld [vmem:[%s4847_s9] sm:$0xff]  }
 0x504   :  { %v880_v35 = vpop.permute.xlu0 %879 }
 0x505   :  { %v894_v38 = vpop.permute.xlu1 %893 }
 0x506   :  { %v934_v39 = vsel %vm932_vm6, %v925_v37, %v894_v38  ;;  %v3674_v37 = vld [vmem:[%s4875_s23] sm:$0xff] }
 0x507   :  { %v942_v41 = vmul.f32 %v934_v39, %v79_v36  ;;  %v3675_v39 = vld [vmem:[%s4875_s23 + $0x8] sm:$0xff]  ;;  %s4880_s23 = smov 32  }
 0x508   :  { %v852_v42 = vpop.permute.xlu0 %851 }
 0x509   :  { %v949_v45 = vpack.c.bf16 %v942_v41, %v941_v40  ;;  %v858_v46 = vpop.permute.xlu1 %857  ;;  %v919_v54 = vsel %vm556_vm3, %v4138_v3, %v852_v42  ;;  %v921_v3 = vsel %vm556_vm3, %v4135_v2, %v856_v27  ;;  %v69_v42 = vld [vmem:[%s4849_s11 + $0x8] sm:$0xff] }
 0x50a   :  { %v930_v11 = vsel %vm923_vm5, %v921_v3, %v880_v35 }
 0x50b   :  { %3285 = vmatpush3.bf16.msra.mxu1 %v949_v45  ;;  %v3569_v45 = vld [vmem:[%s4847_s9 + $0x8] sm:$0xff]  }
 0x50c   :  { %3286 = vmatprep.subr.bf16.mxu1 %v3733_v6  ;;  %v876_v47 = vpop.permute.xlu0 %875 }
 0x50d   :  { %v882_v48 = vpop.permute.xlu1 %881  ;;  %v928_v57 = vsel %vm923_vm5, %v919_v54, %v876_v47  ;;  %v3571_v47 = vld [vmem:[%s4848_s10 + $0x8] sm:$0xff]   ;;  %v3573_v54 = vld [vmem:[%s4848_s10 + $0x18] sm:$0xff]  }
 0x50f   :  { %3287 = vmatpush3.bf16.msra.mxu1 %v950_v28  ;;  %v4258_v28 = vld [vmem:[%s4849_s11] sm:$0xff] }
 0x510   :  { %3288 = vmatprep.subr.bf16.mxu1 %v3733_v6  ;;  %v900_v52 = vpop.permute.xlu0 %899  ;;  %3308 = vmatprep.mubr.msk.f32.mxu0 %vm923_vm5, %v4258_v28 }
 0x511   :  { %v854_v51 = vpop.permute.xlu1 %853  ;;  %v937_v61 = vsel %vm932_vm6, %v928_v57, %v900_v52 }
 0x512   :  { %v920_v62 = vsel %vm556_vm3, %v4143_v5, %v854_v51  ;;  %v945_v12 = vmul.f32 %v937_v61, %v82_v58  ;;  %v922_v5 = vsel %vm556_vm3, %v4141_v4, %v858_v46  ;;  %v3570_v46 = vld [vmem:[%s4848_s10] sm:$0xff]  }
 0x513   :  { %v931_v2 = vsel %vm923_vm5, %v922_v5, %v882_v48 }
 0x514   :  { %v904_v0 = vpop.permute.xlu0 %903 }
 0x515   :  { %v878_v53 = vpop.permute.xlu1 %877  ;;  %v939_v13 = vsel %vm932_vm6, %v930_v11, %v904_v0 }
 0x516   :  { %v929_v1 = vsel %vm923_vm5, %v920_v62, %v878_v53  ;;  %v947_v18 = vmul.f32 %v939_v13, %v84_v10  ;;  %v3572_v53 = vld [vmem:[%s4848_s10 + $0x10] sm:$0xff]   ;;  %v3574_v10 = vld [vmem:[%s4876_s28 + $0x40] sm:$0xff]  }
 0x517   :  { %v3575_v13 = vld [vmem:[%s4877_s30 + $0x40] sm:$0xff]  }
 0x519   :  { %v902_v7 = vpop.permute.xlu1 %901 }
 0x51a   :  { %v938_v9 = vsel %vm932_vm6, %v929_v1, %v902_v7 }
 0x51b   :  { %v946_v8 = vmul.f32 %v938_v9, %v83_v63 }
 0x51d   :  { %v951_v15 = vpack.c.bf16 %v946_v8, %v945_v12  ;;  %v906_v16 = vpop.permute.xlu1 %905 }
 0x51e   :  { %v940_v17 = vsel %vm932_vm6, %v931_v2, %v906_v16  ;;  %v3577_v2 = vld [vmem:[%s4877_s30 + $0x48] sm:$0xff]   ;;  %v3579_v16 = vld [vmem:[%s4877_s30 + $0x50] sm:$0xff]  }
 0x51f   :  { %v948_v19 = vmul.f32 %v940_v17, %v85_v14  ;;  %3289 = vmatpush3.bf16.msra.mxu1 %v951_v15  ;;  %v3576_v14 = vld [vmem:[%s4876_s28 + $0x48] sm:$0xff]   ;;  %v3578_v15 = vld [vmem:[%s4876_s28 + $0x50] sm:$0xff]   ;;  %v3580_v17 = vld [vmem:[%s4876_s28 + $0x58] sm:$0xff]  }
 0x520   :  { %3290 = vmatprep.subr.bf16.mxu1 %v3733_v6 }
 0x521   :  { %v952_v4 = vpack.c.bf16 %v948_v19, %v947_v18  ;;  %v3581_v18 = vld [vmem:[%s4877_s30 + $0x58] sm:$0xff]   ;;  %v3582_v19 = vld [vmem:[%s4876_s28 + $0x60] sm:$0xff]  }
 0x523   :  { %3291 = vmatpush3.bf16.msra.mxu1 %v952_v4  ;;  %v3583_v4 = vld [vmem:[%s4877_s30 + $0x60] sm:$0xff]  }
 0x524   :  { %3296 = vmatprep.subr.bf16.mxu1 %v3733_v6 }
 0x526   :  { %3293 = vmatmul.mubr.msk.bf16.vlgmr.msra.gmra.mrb[16].mxu1 %vm119_vm1, %v3565_v20  ;;  %v3584_v20 = vld [vmem:[%s4876_s28 + $0x68] sm:$0xff]  }
 0x527   :  { %3297 = vmatpush3.bf16.msra.mxu1 %v3566_v21  ;;  %3300 = vmatprep.mubr.msk.bf16.mxu1 %vm3734_vm4, %v3733_v6  ;;  %v3585_v21 = vld [vmem:[%s4877_s30 + $0x68] sm:$0xff]  }
 0x528   :  { %3298 = vmatprep.subr.bf16.mxu1 %v3733_v6 }
 0x52b   :  { %3299 = vmatpush3.bf16.msra.mxu1 %v3567_v22  ;;  %v3586_v22 = vld [vmem:[%s4876_s28 + $0x70] sm:$0xff]  }
 0x52c   :  { %3311 = vmatprep.subr.bf16.mxu1 %v3733_v6 }
 0x5f9   :  { %v995_v23 = vpop.f32.mrb[16].mxu1 }
 0x5fa   :  { %v3294_v24 = vpop.f32.mrb[17].mxu1 }
 0x5fb   :  { %v998_v25 = vpop.f32.mrb[18].mxu1  ;;  %v3588_v24 = vld [vmem:[%s4876_s28 + $0x78] sm:$0xff]   ;;  %s4881_s28 = smov 64  }
 0x5fc   :  { %v1002_v26 = vpack.c.bf16 %v998_v25, %v995_v23  ;;  %v3295_v27 = vpop.f32.mrb[19].mxu1  ;;  %v3587_v23 = vld [vmem:[%s4877_s30 + $0x70] sm:$0xff]   ;;  %v3589_v25 = vld [vmem:[%s4877_s30 + $0x78] sm:$0xff]   ;;  %s4882_s30 = smov 96  }
 0x5fe   :  { %3301 = vmatmul.mubr.msk.bf16.vlgmr.msra.gmra.mrb[20].mxu1 %vm116_vm0, %v1002_v26 }
 0x5ff   :  { %3315 = vmatprep.mubr.msk.bf16.mxu1 %vm3734_vm4, %v3733_v6  ;;  %3312 = vmatpush3.bf16.msra.mxu1 %v3568_v29  ;;  %v3590_v29 = vld [vmem:[%s4878_s22 + $0x40] sm:$0xff]  }
 0x600   :  { %3313 = vmatprep.subr.bf16.mxu1 %v3733_v6 }
 0x603   :  { %3314 = vmatpush3.bf16.msra.mxu1 %v3569_v45  ;;  %v3677_v45 = vld [vmem:[%s4851_s13 + $0x18] sm:$0xff] }
 0x6d1   :  { %v1063_v31 = vpop.f32.mrb[20].mxu1 }
 0x6d2   :  { %v1064_v32 = vadd.f32 %v2866_v30, %v1063_v31  ;;  %v3302_v33 = vpop.f32.mrb[21].mxu1 }
 0x6d3   :  { %v1066_v34 = vpop.f32.mrb[22].mxu1 }
 0x6d4   :  { %v1067_v35 = vadd.f32 %v2866_v30, %v1066_v34  ;;  %v3303_v36 = vpop.f32.mrb[23].mxu1  ;;  %v1070_v38 = vadd.f32 %v3674_v37, %v1064_v32 }
 0x6d6   :  { %v1071_v40 = vadd.f32 %v3675_v39, %v1067_v35 }
 0x6d8   :  { %v3503_v41 = vpack.c.bf16 %v1071_v40, %v1070_v38 }
 0x6da   :  { %3504 = vmatprep.subr.bf16.mxu0 %v3503_v41 }
 0x6db   :  { %3506 = vmatpush3.bf16.msra.mxu0 %v3503_v41  ;;  %v3676_v41 = vld [vmem:[%s4851_s13 + $0x8] sm:$0xff] }
 0x6dc   :  { %3319 = vmatprep.subr.bf16.mxu0 %v3733_v6 }
 0x6de   :  { %3309 = vmatmul.mubr.msk.f32.vlgmr.msra.gmra.mrb[24].mxu0 %vm923_vm5, %v69_v42 }
 0x6df   :  { %3327 = vmatprep.mubr.msk.bf16.mxu0 %vm3734_vm4, %v3733_v6  ;;  %3320 = vmatpush3.bf16.msra.mxu0 %v3570_v46 }
 0x6e0   :  { %3321 = vmatprep.subr.bf16.mxu0 %v3733_v6 }
 0x6e3   :  { %3322 = vmatpush3.bf16.msra.mxu0 %v3571_v47  ;;  %v3678_v47 = vld [vmem:[%s4851_s13 + $0x28] sm:$0xff] }
 0x6e4   :  { %3323 = vmatprep.subr.bf16.mxu0 %v3733_v6 }
 0x6e7   :  { %3324 = vmatpush3.bf16.msra.mxu0 %v3572_v53 }
 0x6e8   :  { %3325 = vmatprep.subr.bf16.mxu0 %v3733_v6 }
 0x6eb   :  { %3326 = vmatpush3.bf16.msra.mxu0 %v3573_v54  ;;  %v3680_v54 = vld [vmem:[%s4851_s13] sm:$0xff] }
 0x6ec   :  { %3362 = vmatprep.subr.bf16.mxu0 %v3575_v13 }
 0x7b1   :  { %v3310_v48 = vpop.f32.mrb[24].mxu0 }
 0x7b2   :  { %v1144_v51 = vpop.f32.mrb[25].mxu0 }
 0x7b3   :  { %v1153_v52 = vpack.c.bf16 %v3310_v48, %v1144_v51 }
 0x7b5   :  { %3316 = vmatmul.mubr.msk.bf16.vlgmr.msra.gmra.mrb[24].mxu1 %vm116_vm0, %v1153_v52 }
 0x7b6   :  { %3335 = vmatprep.mubr.msk.f32.mxu1 %vm923_vm5, %v4258_v28 }
 0x888   :  { %v1207_v57 = vpop.f32.mrb[24].mxu1 }
 0x889   :  { %v3317_v58 = vpop.f32.mrb[25].mxu1  ;;  %v1214_v62 = vmax.f32 %v1207_v57, 0.0 }
 0x88a   :  { %v1210_v61 = vpop.f32.mrb[26].mxu1  ;;  %v3681_v58 = vld [vmem:[%s4851_s13 + $0x10] sm:$0xff] }
 0x88b   :  { %v1215_v63 = vmax.f32 %v1210_v61, 0.0  ;;  %v3318_v0 = vpop.f32.mrb[27].mxu1 }
 0x88c   :  { %v3683_v0 = vld [vmem:[%s4851_s13 + $0x30] sm:$0xff] }
 0x88d   :  { %v1216_v1 = vpack.c.bf16 %v1215_v63, %v1214_v62  ;;  %v3682_v62 = vld [vmem:[%s4851_s13 + $0x20] sm:$0xff] }
 0x88f   :  { %3328 = vmatmul.mubr.msk.bf16.vlgmr.msra.gmra.mrb[28].mxu0 %vm119_vm1, %v1216_v1 }
 0x890   :  { %3363 = vmatpush3.bf16.msra.mxu0 %v3575_v13  ;;  %v3595_v13 = vld [vmem:[%s4878_s22 + $0x68] sm:$0xff]  }
 0x891   :  { %3364 = vmatprep.subr.bf16.mxu0 %v3577_v2 }
 0x894   :  { %3365 = vmatpush3.bf16.msra.mxu0 %v3577_v2  ;;  %v3597_v2 = vld [vmem:[%s4878_s22 + $0x78] sm:$0xff]  }
 0x895   :  { %3366 = vmatprep.subr.bf16.mxu0 %v3579_v16 }
 0x898   :  { %3367 = vmatpush3.bf16.msra.mxu0 %v3579_v16  ;;  %v2932_v16 = vld [vmem:[%s4843_s5 + $0x50] sm:$0xff] }
 0x899   :  { %3368 = vmatprep.subr.bf16.mxu0 %v3581_v18 }
 0x89c   :  { %3369 = vmatpush3.bf16.msra.mxu0 %v3581_v18 }
 0x89d   :  { %3370 = vmatprep.subr.bf16.mxu0 %v3583_v4 }
 0x8a0   :  { %3371 = vmatpush3.bf16.msra.mxu0 %v3583_v4  ;;  %v2901_v4 = vld [vmem:[%s4879_s25 + $0x58] sm:$0xff] }
 0x8a1   :  { %3372 = vmatprep.subr.bf16.mxu0 %v3585_v21 }
 0x8a4   :  { %3373 = vmatpush3.bf16.msra.mxu0 %v3585_v21 }
 0x8a5   :  { %3374 = vmatprep.subr.bf16.mxu0 %v3587_v23 }
 0x8a8   :  { %3375 = vmatpush3.bf16.msra.mxu0 %v3587_v23  ;;  %v2930_v23 = vld [vmem:[%s4843_s5 + $0x40] sm:$0xff] }
 0x8a9   :  { %3376 = vmatprep.subr.bf16.mxu0 %v3589_v25 }
 0x8ac   :  { %3377 = vmatpush3.bf16.msra.mxu0 %v3589_v25  ;;  %v2931_v25 = vld [vmem:[%s4843_s5 + $0x48] sm:$0xff] }
 0x962   :  { %v1286_v7 = vpop.f32.mrb[28].mxu0 }
 0x963   :  { %v1293_v3 = vadd.f32 %v1286_v7, %v1144_v51  ;;  %v3329_v9 = vpop.f32.mrb[29].mxu0  ;;  %v3679_v51 = vld [vmem:[%s4851_s13 + $0x38] sm:$0xff] }
 0x964   :  { %v1289_v11 = vpop.f32.mrb[30].mxu0 }
 0x965   :  { %v1294_v12 = vadd.f32 %v3310_v48, %v1289_v11  ;;  %v3330_v8 = vpop.f32.mrb[31].mxu0 }
 0x966   :  { %v3592_v8 = vld [vmem:[%s4878_s22 + $0x50] sm:$0xff]  }
 0x967   :  { %v3507_v5 = vpack.c.bf16 %v1294_v12, %v1293_v3  ;;  %v3591_v12 = vld [vmem:[%s4878_s22 + $0x48] sm:$0xff]  }
 0x969   :  { %3508 = vmatprep.subr.bf16.mxu1 %v3507_v5 }
 0x96a   :  { %3510 = vmatpush3.bf16.msra.mxu1 %v3507_v5  ;;  %v3593_v5 = vld [vmem:[%s4878_s22 + $0x58] sm:$0xff]  }
 0x96b   :  { %3338 = vmatprep.subr.bf16.mxu1 %v3574_v10 }
 0x96d   :  { %3336 = vmatmul.mubr.msk.f32.vlgmr.msra.gmra.mrb[28].mxu1 %vm923_vm5, %v69_v42 }
 0x96e   :  { %3339 = vmatpush3.bf16.msra.mxu1 %v3574_v10  ;;  %v3594_v10 = vld [vmem:[%s4878_s22 + $0x60] sm:$0xff]  }
 0x96f   :  { %3340 = vmatprep.subr.bf16.mxu1 %v3576_v14 }
 0x972   :  { %3341 = vmatpush3.bf16.msra.mxu1 %v3576_v14  ;;  %v3596_v14 = vld [vmem:[%s4878_s22 + $0x70] sm:$0xff]  }
 0x973   :  { %3342 = vmatprep.subr.bf16.mxu1 %v3578_v15 }
 0x976   :  { %3343 = vmatpush3.bf16.msra.mxu1 %v3578_v15  ;;  %v2900_v15 = vld [vmem:[%s4879_s25 + $0x50] sm:$0xff] }
 0x977   :  { %3344 = vmatprep.subr.bf16.mxu1 %v3580_v17 }
 0x97a   :  { %3345 = vmatpush3.bf16.msra.mxu1 %v3580_v17 }
 0x97b   :  { %3346 = vmatprep.subr.bf16.mxu1 %v3582_v19 }
 0x97e   :  { %3347 = vmatpush3.bf16.msra.mxu1 %v3582_v19  ;;  %v2898_v19 = vld [vmem:[%s4879_s25 + $0x40] sm:$0xff] }
 0x97f   :  { %3348 = vmatprep.subr.bf16.mxu1 %v3584_v20 }
 0x982   :  { %3349 = vmatpush3.bf16.msra.mxu1 %v3584_v20  ;;  %v2933_v20 = vld [vmem:[%s4843_s5 + $0x58] sm:$0xff] }
 0x983   :  { %3350 = vmatprep.subr.bf16.mxu1 %v3586_v22 }
 0x986   :  { %3351 = vmatpush3.bf16.msra.mxu1 %v3586_v22 }
 0x987   :  { %3352 = vmatprep.subr.bf16.mxu1 %v3588_v24 }
 0x98a   :  { %3353 = vmatpush3.bf16.msra.mxu1 %v3588_v24  ;;  %v2899_v24 = vld [vmem:[%s4879_s25 + $0x48] sm:$0xff] }
 0x98b   :  { %3386 = vmatprep.subr.bf16.mxu1 %v3590_v29 }
 0xa40   :  { %v4353_v26 = vpop.f32.mrb[28].mxu1 }
 0xa41   :  { %1374 = vrot.lane.b32.xlu1 %v4353_v26, %s4880_s23  ;;  %v4357_v27 = vpop.f32.mrb[29].mxu1 }
 0xa42   :  { %1372 = vrot.lane.b32.xlu0 %v4357_v27, %s4880_s23 }
 0xa45   :  { %1380 = vrot.lane.b32.xlu1 %v4353_v26, %s4881_s28 }
 0xa46   :  { %1378 = vrot.lane.b32.xlu0 %v4357_v27, %s4881_s28 }
 0xa49   :  { %1386 = vrot.lane.b32.xlu1 %v4353_v26, %s4882_s30 }
 0xa4a   :  { %1384 = vrot.lane.b32.xlu0 %v4357_v27, %s4882_s30 }
 0xab3   :  { %v1375_v30 = vpop.permute.xlu1 %1374 }
 0xab4   :  { %v1373_v31 = vpop.permute.xlu0 %1372  ;;  %v1391_v34 = vsel %vm116_vm0, %v4353_v26, %v1375_v30 }
 0xab5   :  { %v1390_v35 = vsel %vm116_vm0, %v4357_v27, %v1373_v31 }
 0xab7   :  { %v1381_v32 = vpop.permute.xlu1 %1380 }
 0xab8   :  { %v1379_v33 = vpop.permute.xlu0 %1378  ;;  %v1393_v36 = vsel %vm119_vm1, %v1391_v34, %v1381_v32 }
 0xab9   :  { %v1392_v38 = vsel %vm119_vm1, %v1390_v35, %v1379_v33 }
 0xabb   :  { %v1387_v37 = vpop.permute.xlu1 %1386 }
 0xabc   :  { %v1395_v39 = vsel %vm122_vm2, %v1393_v36, %v1387_v37  ;;  %v1385_v40 = vpop.permute.xlu0 %1384 }
 0xabd   :  { %v1397_v42 = vmul.f32 %v3676_v41, %v1395_v39  ;;  %v1399_v46 = vmul.f32 %v3677_v45, %v1395_v39  ;;  %v1401_v48 = vmul.f32 %v3678_v47, %v1395_v39  ;;  %v1403_v52 = vmul.f32 %v3679_v51, %v1395_v39  ;;  %v2904_v47 = vld [vmem:[%s4879_s25 + $0x70] sm:$0xff] }
 0xabe   :  { %v1394_v53 = vsel %vm122_vm2, %v1392_v38, %v1385_v40 }
 0xabf   :  { %v1396_v57 = vmul.f32 %v3680_v54, %v1394_v53  ;;  %v1398_v61 = vmul.f32 %v3681_v58, %v1394_v53  ;;  %v1400_v63 = vmul.f32 %v3682_v62, %v1394_v53  ;;  %v1402_v1 = vmul.f32 %v3683_v0, %v1394_v53  ;;  %v2902_v53 = vld [vmem:[%s4879_s25 + $0x60] sm:$0xff]  ;;  %v2937_v58 = vld [vmem:[%s4843_s5 + $0x78] sm:$0xff]  ;;  %v2903_v0 = vld [vmem:[%s4879_s25 + $0x68] sm:$0xff] }
 0xac1   :  { %v1404_v7 = vpack.c.bf16 %v1397_v42, %v1396_v57  ;;  %v1405_v3 = vpack.c.bf16 %v1399_v46, %v1398_v61  ;;  %v1406_v9 = vpack.c.bf16 %v1401_v48, %v1400_v63  ;;  %v1407_v11 = vpack.c.bf16 %v1403_v52, %v1402_v1  ;;  %v2936_v48 = vld [vmem:[%s4843_s5 + $0x70] sm:$0xff]  ;;  %v2905_v57 = vld [vmem:[%s4879_s25 + $0x78] sm:$0xff]  ;;  %v2934_v63 = vld [vmem:[%s4843_s5 + $0x60] sm:$0xff] }
 0xac2   :  { %v2935_v1 = vld [vmem:[%s4843_s5 + $0x68] sm:$0xff] }
 0xac3   :  { %3354 = vmatprep.mubr.bf16.mxu1 %v1404_v7  ;;  %3378 = vmatprep.mubr.bf16.mxu0 %v1404_v7 }
 0xac4   :  { %3355 = vmatmul.mubr.bf16.vlgmr.msra.gmra.mrb[32].mxu1 %v1405_v3  ;;  %3379 = vmatmul.mubr.bf16.vlgmr.msra.gmra.mrb[32].mxu0 %v1405_v3 }
 0xac5   :  { %3387 = vmatpush3.bf16.msra.mxu1 %v3590_v29  ;;  %3358 = vmatprep.mubr.bf16.mxu1 %v1406_v9 }
 0xac6   :  { %3382 = vmatprep.mubr.bf16.mxu0 %v1406_v9  ;;  %3388 = vmatprep.subr.bf16.mxu1 %v3591_v12 }
 0xac9   :  { %3389 = vmatpush3.bf16.msra.mxu1 %v3591_v12 }
 0xaca   :  { %3390 = vmatprep.subr.bf16.mxu1 %v3592_v8 }
 0xacc   :  { %3359 = vmatmul.mubr.bf16.gmra.mrb[36].mxu1 %v1407_v11  ;;  %3383 = vmatmul.mubr.bf16.gmra.mrb[36].mxu0 %v1407_v11 }
 0xacd   :  { %3391 = vmatpush3.bf16.msra.mxu1 %v3592_v8  ;;  %3402 = vmatprep.mubr.bf16.mxu1 %v1404_v7 }
 0xace   :  { %3392 = vmatprep.subr.bf16.mxu1 %v3593_v5 }
 0xad1   :  { %3393 = vmatpush3.bf16.msra.mxu1 %v3593_v5 }
 0xad2   :  { %3394 = vmatprep.subr.bf16.mxu1 %v3594_v10 }
 0xad5   :  { %3395 = vmatpush3.bf16.msra.mxu1 %v3594_v10 }
 0xad6   :  { %3396 = vmatprep.subr.bf16.mxu1 %v3595_v13 }
 0xad9   :  { %3397 = vmatpush3.bf16.msra.mxu1 %v3595_v13 }
 0xada   :  { %3398 = vmatprep.subr.bf16.mxu1 %v3596_v14 }
 0xadd   :  { %3399 = vmatpush3.bf16.msra.mxu1 %v3596_v14 }
 0xade   :  { %3400 = vmatprep.subr.bf16.mxu1 %v3597_v2 }
 0xae1   :  { %3401 = vmatpush3.bf16.msra.mxu1 %v3597_v2 }
 0xae4   :  { %3403 = vmatmul.mubr.bf16.vlgmr.msra.gmra.mrb[40].mxu1 %v1405_v3 }
 0xae5   :  { %3406 = vmatprep.mubr.bf16.mxu1 %v1406_v9 }
 0xaec   :  { %3407 = vmatmul.mubr.bf16.gmra.mrb[44].mxu1 %v1407_v11 }
 0xb97   :  { %v3356_v17 = vpop.f32.mrb[32].mxu1  ;;  %v3380_v18 = vpop.f32.mrb[32].mxu0 }
 0xb98   :  { %v1516_v21 = vpop.f32.mrb[33].mxu1  ;;  %v1655_v22 = vpop.f32.mrb[33].mxu0  ;;  %v4449_v31 = vadd.f32 %v3356_v17, %v2900_v15  ;;  %v1664_v32 = vadd.f32 %v3380_v18, %v2932_v16 }
 0xb99   :  { %v3357_v29 = vpop.f32.mrb[34].mxu1  ;;  %v3381_v30 = vpop.f32.mrb[34].mxu0  ;;  %v1517_v37 = vadd.f32 %v2898_v19, %v1516_v21  ;;  %v1656_v38 = vadd.f32 %v2930_v23, %v1655_v22  ;;  %v2964_v21 = vld [vmem:[%s4844_s6 + $0x50] sm:$0xff]  ;;  %v2965_v23 = vld [vmem:[%s4844_s6 + $0x58] sm:$0xff] }
 0xb9a   :  { %v4451_v33 = vadd.f32 %v3357_v29, %v2901_v4  ;;  %v1667_v34 = vadd.f32 %v3381_v30, %v2933_v20  ;;  %v1519_v35 = vpop.f32.mrb[35].mxu1  ;;  %v1658_v36 = vpop.f32.mrb[35].mxu0  ;;  %v2962_v29 = vld [vmem:[%s4844_s6 + $0x40] sm:$0xff]  ;;  %v2963_v30 = vld [vmem:[%s4844_s6 + $0x48] sm:$0xff] }
 0xb9b   :  { %v1520_v39 = vadd.f32 %v2899_v24, %v1519_v35  ;;  %v1659_v40 = vadd.f32 %v2931_v25, %v1658_v36 }
 0xb9c   :  { %v1826_v41 = vpack.c.bf16 %v4451_v33, %v4449_v31  ;;  %v1830_v42 = vpack.c.bf16 %v1667_v34, %v1664_v32 }
 0xb9d   :  { %v1825_v45 = vpack.c.bf16 %v1520_v39, %v1517_v37  ;;  %v1829_v46 = vpack.c.bf16 %v1659_v40, %v1656_v38 }
 0xb9e   :  { %v1849_v4 = vsel %vm556_vm3, %v1830_v42, 0 }
 0xb9f   :  { %v3360_v51 = vpop.f32.mrb[36].mxu1  ;;  %v3384_v52 = vpop.f32.mrb[36].mxu0  ;;  %3527 = vmatprep.subr.msk.bf16.mxu0 %vm556_vm3, %v1829_v46  ;;  %3418 = vmatprep.mubr.msk.bf16.mxu0 %vm556_vm3, %v1825_v45  ;;  %v1846_v54 = vsel %vm556_vm3, %v1829_v46, 0  ;;  %v2969_v46 = vld [vmem:[%s4844_s6 + $0x78] sm:$0xff] }
 0xba0   :  { %v1532_v61 = vpop.f32.mrb[37].mxu1  ;;  %v1671_v62 = vpop.f32.mrb[37].mxu0  ;;  %3411 = vmatpush3.bf16.xpose.msra.mxu0 %v1846_v54  ;;  %v1541_v9 = vadd.f32 %v3360_v51, %v2904_v47  ;;  %v1680_v11 = vadd.f32 %v3384_v52, %v2936_v48  ;;  %v2966_v48 = vld [vmem:[%s4844_s6 + $0x60] sm:$0xff]  ;;  %v2967_v51 = vld [vmem:[%s4844_s6 + $0x68] sm:$0xff] }
 0xba1   :  { %v3361_v7 = vpop.f32.mrb[38].mxu1  ;;  %v3385_v3 = vpop.f32.mrb[38].mxu0  ;;  %3528 = vmatprep.subr.msk.bf16.mxu0 %vm556_vm3, %v1830_v42  ;;  %v1533_v13 = vadd.f32 %v2902_v53, %v1532_v61  ;;  %v1672_v14 = vadd.f32 %v2934_v63, %v1671_v62  ;;  %v2968_v42 = vld [vmem:[%s4844_s6 + $0x70] sm:$0xff] }
 0xba2   :  { %v1544_v12 = vadd.f32 %v3361_v7, %v2905_v57  ;;  %v1683_v8 = vadd.f32 %v3385_v3, %v2937_v58  ;;  %v1535_v5 = vpop.f32.mrb[39].mxu1  ;;  %v1674_v10 = vpop.f32.mrb[39].mxu0 }
 0xba3   :  { %v1536_v2 = vadd.f32 %v2903_v0, %v1535_v5  ;;  %v1675_v15 = vadd.f32 %v2935_v1, %v1674_v10  ;;  %v3685_v5 = vld [vmem:[%s4854_s16 + $0x8] sm:$0xff] }
 0xba4   :  { %v1828_v16 = vpack.c.bf16 %v1544_v12, %v1541_v9  ;;  %v1832_v17 = vpack.c.bf16 %v1683_v8, %v1680_v11  ;;  %v3684_v9 = vld [vmem:[%s4854_s16] sm:$0xff] }
 0xba5   :  { %v1827_v18 = vpack.c.bf16 %v1536_v2, %v1533_v13  ;;  %v1831_v19 = vpack.c.bf16 %v1675_v15, %v1672_v14  ;;  %v3686_v13 = vld [vmem:[%s4854_s16 + $0x10] sm:$0xff] }
 0xba6   :  { %v1855_v24 = vsel %vm556_vm3, %v1832_v17, 0 }
 0xba7   :  { %v1852_v20 = vsel %vm556_vm3, %v1831_v19, 0 }
 0xba8   :  { %3413 = vmatpush3.bf16.xpose.msra.mxu0 %v1849_v4 }
 0xba9   :  { %3529 = vmatprep.subr.msk.bf16.mxu0 %vm556_vm3, %v1831_v19 }
 0xbb0   :  { %3415 = vmatpush3.bf16.xpose.msra.mxu0 %v1852_v20 }
 0xbb1   :  { %3530 = vmatprep.subr.msk.bf16.mxu0 %vm556_vm3, %v1832_v17  ;;  %v3687_v17 = vld [vmem:[%s4854_s16 + $0x18] sm:$0xff] }
 0xbb7   :  { %v3404_v22 = vpop.f32.mrb[40].mxu1 }
 0xbb8   :  { %v1794_v25 = vpop.f32.mrb[41].mxu1  ;;  %3417 = vmatpush3.bf16.xpose.msra.mxu0 %v1855_v24  ;;  %v1803_v34 = vadd.f32 %v3404_v22, %v2964_v21  ;;  %v3688_v24 = vld [vmem:[%s4854_s16 + $0x20] sm:$0xff] }
 0xbb9   :  { %v3405_v32 = vpop.f32.mrb[42].mxu1  ;;  %3442 = vmatprep.subr.bf16.mxu0 %v3733_v6  ;;  %v1795_v37 = vadd.f32 %v2962_v29, %v1794_v25 }
 0xbba   :  { %v1806_v35 = vadd.f32 %v3405_v32, %v2965_v23  ;;  %v1797_v36 = vpop.f32.mrb[43].mxu1 }
 0xbbb   :  { %v1798_v38 = vadd.f32 %v2963_v30, %v1797_v36  ;;  %v3690_v36 = vld [vmem:[%s4854_s16 + $0x28] sm:$0xff] }
 0xbbc   :  { %v2031_v39 = vpack.c.bf16 %v1806_v35, %v1803_v34  ;;  %v3689_v34 = vld [vmem:[%s4854_s16 + $0x30] sm:$0xff] }
 0xbbd   :  { %v2030_v40 = vpack.c.bf16 %v1798_v38, %v1795_v37 }
 0xbbf   :  { %v3408_v45 = vpop.f32.mrb[44].mxu1  ;;  %3426 = vmatprep.subr.bf16.mxu1 %v2030_v40  ;;  %3419 = vmatmul.mubr.msk.bf16.vlgmr.msra.gmra.mrb[40].mxu0 %vm556_vm3, %v1826_v41 }
 0xbc0   :  { %v1810_v47 = vpop.f32.mrb[45].mxu1  ;;  %3427 = vmatpush3.bf16.msra.mxu1 %v2030_v40  ;;  %3422 = vmatprep.mubr.msk.bf16.mxu0 %vm556_vm3, %v1827_v18  ;;  %v1819_v31 = vadd.f32 %v3408_v45, %v2968_v42  ;;  %v3691_v40 = vld [vmem:[%s4854_s16 + $0x38] sm:$0xff] }
 0xbc1   :  { %v3409_v52 = vpop.f32.mrb[46].mxu1  ;;  %3428 = vmatprep.subr.bf16.mxu1 %v2031_v39  ;;  %v1811_v53 = vadd.f32 %v2966_v48, %v1810_v47 }
 0xbc2   :  { %v1822_v33 = vadd.f32 %v3409_v52, %v2969_v46  ;;  %v1813_v41 = vpop.f32.mrb[47].mxu1 }
 0xbc3   :  { %v1814_v54 = vadd.f32 %v2967_v51, %v1813_v41 }
 0xbc4   :  { %v2033_v57 = vpack.c.bf16 %v1822_v33, %v1819_v31  ;;  %3429 = vmatpush3.bf16.msra.mxu1 %v2031_v39 }
 0xbc5   :  { %v2032_v58 = vpack.c.bf16 %v1814_v54, %v1811_v53 }
 0xbc7   :  { %3430 = vmatprep.subr.bf16.mxu1 %v2032_v58  ;;  %3423 = vmatmul.mubr.msk.bf16.gmra.mrb[44].mxu0 %vm556_vm3, %v1828_v16 }
 0xbc8   :  { %3431 = vmatpush3.bf16.msra.mxu1 %v2032_v58  ;;  %3450 = vmatprep.mubr.msk.bf16.mxu0 %vm3734_vm4, %v3733_v6 }
 0xbc9   :  { %3432 = vmatprep.subr.bf16.mxu1 %v2033_v57 }
 0xbcc   :  { %3433 = vmatpush3.bf16.msra.mxu1 %v2033_v57 }
 0xc92   :  { %v3420_v61 = vpop.f32.mrb[40].mxu0 }
 0xc93   :  { %v1891_v62 = vpop.f32.mrb[41].mxu0  ;;  %v1924_v63 = vmul.f32 0.35355338, %v3420_v61 }
 0xc94   :  { %v1922_v0 = vmul.f32 0.35355338, %v1891_v62  ;;  %v3421_v1 = vpop.f32.mrb[42].mxu0 }
 0xc95   :  { %v1894_v7 = vpop.f32.mrb[43].mxu0  ;;  %v1925_v12 = vmul.f32 0.35355338, %v3421_v1  ;;  %v1932_v14 = vadd.f32 %v3686_v13, %v1924_v63 }
 0xc96   :  { %v1923_v3 = vmul.f32 0.35355338, %v1894_v7  ;;  %v1930_v11 = vadd.f32 %v3684_v9, %v1922_v0 }
 0xc97   :  { %v1933_v18 = vadd.f32 %v3687_v17, %v1925_v12  ;;  %v1944_v21 = vsel %vm119_vm1, %v1932_v14, -inf }
 0xc98   :  { %v1938_v8 = vsel %vm119_vm1, %v1930_v11, -inf  ;;  %v1931_v10 = vadd.f32 %v3685_v5, %v1923_v3 }
 0xc99   :  { %1939 = vmax.xlane.f32.xlu0 %v1938_v8  ;;  %v1947_v29 = vsel %vm119_vm1, %v1933_v18, -inf }
 0xc9a   :  { %v3424_v2 = vpop.f32.mrb[44].mxu0  ;;  %v1941_v15 = vsel %vm119_vm1, %v1931_v10, -inf }
 0xc9b   :  { %1942 = vmax.xlane.f32.xlu1 %v1941_v15  ;;  %v1907_v16 = vpop.f32.mrb[45].mxu0  ;;  %v1928_v19 = vmul.f32 0.35355338, %v3424_v2 }
 0xc9c   :  { %v1926_v4 = vmul.f32 0.35355338, %v1907_v16  ;;  %v3425_v20 = vpop.f32.mrb[46].mxu0 }
 0xc9d   :  { %1945 = vmax.xlane.f32.xlu0 %v1944_v21  ;;  %v1910_v22 = vpop.f32.mrb[47].mxu0  ;;  %v1929_v30 = vmul.f32 0.35355338, %v3425_v20  ;;  %v1936_v35 = vadd.f32 %v3689_v34, %v1928_v19 }
 0xc9e   :  { %v1927_v23 = vmul.f32 0.35355338, %v1910_v22  ;;  %v1934_v25 = vadd.f32 %v3688_v24, %v1926_v4 }
 0xc9f   :  { %v1956_v38 = vsel %vm119_vm1, %v1936_v35, -inf  ;;  %v1937_v42 = vadd.f32 %v3691_v40, %v1929_v30 }
 0xca0   :  { %v1950_v32 = vsel %vm119_vm1, %v1934_v25, -inf  ;;  %v1935_v37 = vadd.f32 %v3690_v36, %v1927_v23 }
 0xca1   :  { %1948 = vmax.xlane.f32.xlu0 %v1947_v29  ;;  %1951 = vmax.xlane.f32.xlu1 %v1950_v32  ;;  %v1959_v45 = vsel %vm119_vm1, %v1937_v42, -inf }
 0xca2   :  { %v1953_v39 = vsel %vm119_vm1, %v1935_v37, -inf }
 0xca5   :  { %1957 = vmax.xlane.f32.xlu1 %v1956_v38  ;;  %1954 = vmax.xlane.f32.xlu0 %v1953_v39 }
 0xca9   :  { %1960 = vmax.xlane.f32.xlu0 %v1959_v45 }
 0xd26   :  { %v1940_v46 = vpop.xlane.xlu0 %1939 }
 0xd27   :  { %v1962_v47 = vsub.f32 %v1930_v11, %v1940_v46 }
 0xd28   :  { %v1943_v48 = vpop.xlane.xlu1 %1942 }
 0xd29   :  { %v1970_v51 = vmul.f32 1.442695, %v1962_v47  ;;  %v1963_v52 = vsub.f32 %v1931_v10, %v1943_v48 }
 0xd2a   :  { %v1946_v31 = vpop.xlane.xlu0 %1945 }
 0xd2b   :  { %3638 = vpow2.f32 %v1970_v51  ;;  %v1972_v33 = vmul.f32 1.442695, %v1963_v52  ;;  %v1964_v41 = vsub.f32 %v1932_v14, %v1946_v31 }
 0xd2d   :  { %3640 = vpow2.f32 %v1972_v33  ;;  %v1974_v53 = vmul.f32 1.442695, %v1964_v41 }
 0xd2e   :  { %v1949_v54 = vpop.xlane.xlu0 %1948  ;;  %v1952_v57 = vpop.xlane.xlu1 %1951 }
 0xd2f   :  { %3642 = vpow2.f32 %v1974_v53  ;;  %v1965_v58 = vsub.f32 %v1933_v18, %v1949_v54  ;;  %v1966_v61 = vsub.f32 %v1934_v25, %v1952_v57 }
 0xd31   :  { %v1976_v62 = vmul.f32 1.442695, %v1965_v58  ;;  %v1978_v63 = vmul.f32 1.442695, %v1966_v61 }
 0xd32   :  { %v1958_v0 = vpop.xlane.xlu1 %1957  ;;  %v1955_v1 = vpop.xlane.xlu0 %1954 }
 0xd33   :  { %3644 = vpow2.f32 %v1976_v62  ;;  %v1968_v7 = vsub.f32 %v1936_v35, %v1958_v0  ;;  %v1967_v3 = vsub.f32 %v1935_v37, %v1955_v1 }
 0xd34   :  { %3646 = vpow2.f32 %v1978_v63 }
 0xd35   :  { %v3639_v9 = vpop.eup %3638  ;;  %v1982_v11 = vmul.f32 1.442695, %v1968_v7  ;;  %v1980_v12 = vmul.f32 1.442695, %v1967_v3 }
 0xd36   :  { %v1961_v8 = vpop.xlane.xlu0 %1960  ;;  %v1986_v5 = vsel %vm119_vm1, %v3639_v9, 0.0 }
 0xd37   :  { %v3641_v10 = vpop.eup %3640  ;;  %3648 = vpow2.f32 %v1982_v11  ;;  %v1969_v13 = vsub.f32 %v1937_v42, %v1961_v8  ;;  %1987 = vadd.xlane.f32.xlu1 %v1986_v5 }
 0xd38   :  { %3650 = vpow2.f32 %v1980_v12  ;;  %v1989_v14 = vsel %vm119_vm1, %v3641_v10, 0.0 }
 0xd39   :  { %v3643_v2 = vpop.eup %3642  ;;  %v1984_v15 = vmul.f32 1.442695, %v1969_v13  ;;  %1990 = vadd.xlane.f32.xlu0 %v1989_v14 }
 0xd3a   :  { %v1992_v16 = vsel %vm119_vm1, %v3643_v2, 0.0 }
 0xd3b   :  { %3652 = vpow2.f32 %v1984_v15  ;;  %1993 = vadd.xlane.f32.xlu1 %v1992_v16 }
 0xd3d   :  { %v3645_v17 = vpop.eup %3644 }
 0xd3e   :  { %v3647_v18 = vpop.eup %3646  ;;  %v1995_v19 = vsel %vm119_vm1, %v3645_v17, 0.0 }
 0xd3f   :  { %v1998_v4 = vsel %vm119_vm1, %v3647_v18, 0.0  ;;  %1996 = vadd.xlane.f32.xlu0 %v1995_v19 }
 0xd40   :  { %1999 = vadd.xlane.f32.xlu1 %v1998_v4 }
 0xd41   :  { %v3649_v20 = vpop.eup %3648 }
 0xd42   :  { %v3651_v21 = vpop.eup %3650  ;;  %v2004_v22 = vsel %vm119_vm1, %v3649_v20, 0.0 }
 0xd43   :  { %v2001_v23 = vsel %vm119_vm1, %v3651_v21, 0.0 }
 0xd44   :  { %2005 = vadd.xlane.f32.xlu1 %v2004_v22  ;;  %2002 = vadd.xlane.f32.xlu0 %v2001_v23 }
 0xd45   :  { %v3653_v24 = vpop.eup %3652 }
 0xd46   :  { %v2007_v25 = vsel %vm119_vm1, %v3653_v24, 0.0 }
 0xd48   :  { %2008 = vadd.xlane.f32.xlu0 %v2007_v25  ;;  %v3692_v25 = vld [vmem:[%s4852_s14 + $0x10] sm:$0xff] }
 0xdc4   :  { %v1988_v29 = vpop.xlane.xlu1 %1987 }
 0xdc5   :  { %3654 = vrcp.f32 %v1988_v29 }
 0xdc6   :  { %v1991_v30 = vpop.xlane.xlu0 %1990 }
 0xdc7   :  { %3656 = vrcp.f32 %v1991_v30  ;;  %v3693_v30 = vld [vmem:[%s4852_s14 + $0x18] sm:$0xff] }
 0xdc8   :  { %v1994_v32 = vpop.xlane.xlu1 %1993 }
 0xdc9   :  { %3658 = vrcp.f32 %v1994_v32 }
 0xdcc   :  { %v1997_v34 = vpop.xlane.xlu0 %1996 }
 0xdcd   :  { %v2000_v35 = vpop.xlane.xlu1 %1999  ;;  %3660 = vrcp.f32 %v1997_v34 }
 0xdce   :  { %3662 = vrcp.f32 %v2000_v35 }
 0xdcf   :  { %v3655_v36 = vpop.eup %3654 }
 0xdd0   :  { %v4561_v40 = vmul.f32 %v3655_v36, %v3639_v9 }
 0xdd1   :  { %v3657_v37 = vpop.eup %3656  ;;  %v2006_v38 = vpop.xlane.xlu1 %2005 }
 0xdd2   :  { %v2003_v39 = vpop.xlane.xlu0 %2002  ;;  %v4563_v42 = vmul.f32 %v3657_v37, %v3641_v10 }
 0xdd3   :  { %3664 = vrcp.f32 %v2003_v39  ;;  %v3659_v46 = vpop.eup %3658 }
 0xdd4   :  { %3666 = vrcp.f32 %v2006_v38  ;;  %v2026_v45 = vpack.c.bf16 %v4563_v42, %v4561_v40  ;;  %v4568_v51 = vmul.f32 %v3659_v46, %v3643_v2 }
 0xdd6   :  { %v2009_v47 = vpop.xlane.xlu0 %2008  ;;  %3434 = vmatprep.mubr.msk.bf16.mxu1 %vm119_vm1, %v2026_v45 }
 0xdd7   :  { %3668 = vrcp.f32 %v2009_v47  ;;  %v3661_v48 = vpop.eup %3660 }
 0xdd8   :  { %v4570_v52 = vmul.f32 %v3661_v48, %v3645_v17  ;;  %v3663_v33 = vpop.eup %3662 }
 0xdd9   :  { %v4575_v54 = vmul.f32 %v3663_v33, %v3647_v18  ;;  %v3694_v33 = vld [vmem:[%s4852_s14] sm:$0xff] }
 0xdda   :  { %v2027_v31 = vpack.c.bf16 %v4570_v52, %v4568_v51 }
 0xddc   :  { %3435 = vmatmul.mubr.msk.bf16.vlgmr.msra.gmra.mrb[48].mxu1 %vm119_vm1, %v2027_v31 }
 0xddd   :  { %v3665_v41 = vpop.eup %3664 }
 0xdde   :  { %v3667_v53 = vpop.eup %3666  ;;  %v4577_v57 = vmul.f32 %v3665_v41, %v3651_v21 }
 0xddf   :  { %v4581_v62 = vmul.f32 %v3667_v53, %v3649_v20  ;;  %v3695_v53 = vld [vmem:[%s4852_s14 + $0x8] sm:$0xff] }
 0xde0   :  { %v2028_v61 = vpack.c.bf16 %v4577_v57, %v4575_v54 }
 0xde1   :  { %v3669_v58 = vpop.eup %3668 }
 0xde2   :  { %v4583_v63 = vmul.f32 %v3669_v58, %v3653_v24  ;;  %3438 = vmatprep.mubr.msk.bf16.mxu1 %vm119_vm1, %v2028_v61 }
 0xde4   :  { %v2029_v0 = vpack.c.bf16 %v4583_v63, %v4581_v62 }
 0xde6   :  { %3439 = vmatmul.mubr.msk.bf16.gmra.mrb[52].mxu1 %vm119_vm1, %v2029_v0 }
 0xde7   :  { %3466 = vmatprep.mubr.msk.f32.mxu1 %vm923_vm5, %v4258_v28 }
 0xeaf   :  { %v3436_v1 = vpop.f32.mrb[48].mxu1 }
 0xeb0   :  { %2123 = vrot.lane.b32.xlu0 %v3436_v1, %s3730_s27  ;;  %v2080_v7 = vpop.f32.mrb[49].mxu1 }
 0xeb1   :  { %2119 = vrot.lane.b32.xlu1 %v2080_v7, %s3730_s27  ;;  %v3437_v3 = vpop.f32.mrb[50].mxu1 }
 0xeb2   :  { %v2083_v9 = vpop.f32.mrb[51].mxu1 }
 0xeb4   :  { %2147 = vrot.lane.b32.xlu0 %v3436_v1, %s3731_s29 }
 0xeb5   :  { %2143 = vrot.lane.b32.xlu1 %v2080_v7, %s3731_s29 }
 0xeb8   :  { %2171 = vrot.lane.b32.xlu0 %v3436_v1, %s3732_s3 }
 0xeb9   :  { %v4595_v11 = vpop.f32.mrb[52].mxu1  ;;  %2125 = vrot.lane.b32.xlu1 %v3437_v3, %s3730_s27 }
 0xeba   :  { %v4598_v12 = vpop.f32.mrb[53].mxu1 }
 0xebb   :  { %v4601_v28 = vpop.f32.mrb[54].mxu1 }
 0xebc   :  { %v4603_v8 = vpop.f32.mrb[55].mxu1  ;;  %2167 = vrot.lane.b32.xlu0 %v2080_v7, %s3732_s3 }
 0xebd   :  { %2149 = vrot.lane.b32.xlu1 %v3437_v3, %s3731_s29 }
 0xec0   :  { %2121 = vrot.lane.b32.xlu0 %v2083_v9, %s3730_s27 }
 0xec1   :  { %2173 = vrot.lane.b32.xlu1 %v3437_v3, %s3732_s3 }
 0xec4   :  { %2131 = vrot.lane.b32.xlu0 %v4595_v11, %s3730_s27 }
 0xec5   :  { %2145 = vrot.lane.b32.xlu1 %v2083_v9, %s3731_s29 }
 0xec8   :  { %2155 = vrot.lane.b32.xlu0 %v4595_v11, %s3731_s29 }
 0xec9   :  { %2169 = vrot.lane.b32.xlu1 %v2083_v9, %s3732_s3 }
 0xecc   :  { %2127 = vrot.lane.b32.xlu0 %v4598_v12, %s3730_s27 }
 0xecd   :  { %2133 = vrot.lane.b32.xlu1 %v4601_v28, %s3730_s27 }
 0xed0   :  { %2151 = vrot.lane.b32.xlu0 %v4598_v12, %s3731_s29 }
 0xed1   :  { %2157 = vrot.lane.b32.xlu1 %v4601_v28, %s3731_s29 }
 0xed4   :  { %2175 = vrot.lane.b32.xlu0 %v4598_v12, %s3732_s3 }
 0xed5   :  { %2129 = vrot.lane.b32.xlu1 %v4603_v8, %s3730_s27 }
 0xed8   :  { %2179 = vrot.lane.b32.xlu0 %v4595_v11, %s3732_s3 }
 0xed9   :  { %2153 = vrot.lane.b32.xlu1 %v4603_v8, %s3731_s29 }
 0xedd   :  { %2177 = vrot.lane.b32.xlu1 %v4603_v8, %s3732_s3 }
 0xee1   :  { %2181 = vrot.lane.b32.xlu1 %v4601_v28, %s3732_s3 }
 0xf22   :  { %v2124_v5 = vpop.permute.xlu0 %2123 }
 0xf23   :  { %v2120_v10 = vpop.permute.xlu1 %2119  ;;  %v2193_v18 = vsel %vm556_vm3, %v3436_v1, %v2124_v5 }
 0xf24   :  { %v2191_v37 = vsel %vm556_vm3, %v2080_v7, %v2120_v10 }
 0xf26   :  { %v2148_v13 = vpop.permute.xlu0 %2147 }
 0xf27   :  { %v2144_v14 = vpop.permute.xlu1 %2143  ;;  %v2201_v19 = vsel %vm923_vm5, %v2193_v18, %v2148_v13 }
 0xf28   :  { %v2199_v38 = vsel %vm923_vm5, %v2191_v37, %v2144_v14  ;;  %v3598_v37 = vld [vmem:[%s4845_s7 + $0x10] sm:$0xff]  }
 0xf2a   :  { %v2172_v2 = vpop.permute.xlu0 %2171 }
 0xf2b   :  { %v2126_v15 = vpop.permute.xlu1 %2125  ;;  %v2209_v4 = vsel %vm932_vm6, %v2201_v19, %v2172_v2 }
 0xf2c   :  { %v2194_v20 = vsel %vm556_vm3, %v3437_v3, %v2126_v15  ;;  %v2217_v29 = vmul.f32 %v3692_v25, %v2209_v4 }
 0xf2e   :  { %v2168_v16 = vpop.permute.xlu0 %2167 }
 0xf2f   :  { %v2150_v17 = vpop.permute.xlu1 %2149  ;;  %v2207_v39 = vsel %vm932_vm6, %v2199_v38, %v2168_v16  ;;  %v3700_v38 = vld [vmem:[%s4853_s15] sm:$0xff]  }
 0xf30   :  { %v2202_v22 = vsel %vm923_vm5, %v2194_v20, %v2150_v17  ;;  %v2215_v41 = vmul.f32 %v3694_v33, %v2207_v39  ;;  %v3599_v39 = vld [vmem:[%s4845_s7 + $0x18] sm:$0xff]   ;;  %v3600_v33 = vld [vmem:[%s4847_s9 + $0x10] sm:$0xff]  }
 0xf32   :  { %v2122_v21 = vpop.permute.xlu0 %2121 }
 0xf33   :  { %v2174_v23 = vpop.permute.xlu1 %2173  ;;  %v2192_v45 = vsel %vm556_vm3, %v2083_v9, %v2122_v21 }
 0xf34   :  { %v2210_v24 = vsel %vm932_vm6, %v2202_v22, %v2174_v23 }
 0xf35   :  { %v2218_v32 = vmul.f32 %v3693_v30, %v2210_v24 }
 0xf36   :  { %v2132_v34 = vpop.permute.xlu0 %2131 }
 0xf37   :  { %v2224_v35 = vpack.c.bf16 %v2218_v32, %v2217_v29  ;;  %v2146_v36 = vpop.permute.xlu1 %2145  ;;  %v2197_v19 = vsel %vm556_vm3, %v4595_v11, %v2132_v34  ;;  %v3698_v32 = vld [vmem:[%s4852_s14 + $0x30] sm:$0xff] }
 0xf38   :  { %v2200_v47 = vsel %vm923_vm5, %v2192_v45, %v2146_v36 }
 0xf3a   :  { %v2156_v46 = vpop.permute.xlu0 %2155 }
 0xf3b   :  { %v2170_v48 = vpop.permute.xlu1 %2169  ;;  %v2205_v20 = vsel %vm923_vm5, %v2197_v19, %v2156_v46 }
 0xf3c   :  { %v2208_v31 = vsel %vm932_vm6, %v2200_v47, %v2170_v48 }
 0xf3d   :  { %v2216_v58 = vmul.f32 %v3695_v53, %v2208_v31 }
 0xf3e   :  { %v2128_v61 = vpop.permute.xlu0 %2127 }
 0xf3f   :  { %v2223_v0 = vpack.c.bf16 %v2216_v58, %v2215_v41  ;;  %v2134_v1 = vpop.permute.xlu1 %2133  ;;  %v2195_v13 = vsel %vm556_vm3, %v4598_v12, %v2128_v61  ;;  %v3696_v12 = vld [vmem:[%s4852_s14 + $0x20] sm:$0xff] }
 0xf40   :  { %v2198_v23 = vsel %vm556_vm3, %v4601_v28, %v2134_v1  ;;  %v2992_v41 = vld [vmem:[%s4846_s8 + $0x1] ss:$0 sm:$0xff] }
 0xf41   :  { %3443 = vmatpush3.bf16.msra.mxu0 %v2223_v0 }
 0xf42   :  { %3444 = vmatprep.subr.bf16.mxu0 %v3733_v6  ;;  %v2152_v7 = vpop.permute.xlu0 %2151 }
 0xf43   :  { %v2158_v3 = vpop.permute.xlu1 %2157  ;;  %v2203_v14 = vsel %vm923_vm5, %v2195_v13, %v2152_v7  ;;  %v3603_v13 = vld [vmem:[%s4848_s10 + $0x28] sm:$0xff]  }
 0xf44   :  { %v2206_v11 = vsel %vm923_vm5, %v2198_v23, %v2158_v3 }
 0xf45   :  { %3445 = vmatpush3.bf16.msra.mxu0 %v2224_v35  ;;  %v3699_v35 = vld [vmem:[%s4852_s14 + $0x38] sm:$0xff] }
 0xf46   :  { %3446 = vmatprep.subr.bf16.mxu0 %v3733_v6  ;;  %v2176_v5 = vpop.permute.xlu0 %2175 }
 0xf47   :  { %v2130_v9 = vpop.permute.xlu1 %2129  ;;  %v2211_v2 = vsel %vm932_vm6, %v2203_v14, %v2176_v5 }
 0xf48   :  { %v2196_v15 = vsel %vm556_vm3, %v4603_v8, %v2130_v9  ;;  %v2219_v21 = vmul.f32 %v3696_v12, %v2211_v2  ;;  %v3697_v8 = vld [vmem:[%s4852_s14 + $0x28] sm:$0xff] }
 0xf4a   :  { %v2180_v16 = vpop.permute.xlu0 %2179 }
 0xf4b   :  { %v2154_v10 = vpop.permute.xlu1 %2153  ;;  %v2213_v24 = vsel %vm932_vm6, %v2205_v20, %v2180_v16  ;;  %v3702_v16 = vld [vmem:[%s4849_s11] sm:$0xff] }
 0xf4c   :  { %v2204_v17 = vsel %vm923_vm5, %v2196_v15, %v2154_v10  ;;  %v2221_v34 = vmul.f32 %v3698_v32, %v2213_v24  ;;  %v3701_v10 = vld [vmem:[%s4849_s11 + $0x8] sm:$0xff] }
 0xf4f   :  { %v2178_v18 = vpop.permute.xlu1 %2177 }
 0xf50   :  { %v2212_v4 = vsel %vm932_vm6, %v2204_v17, %v2178_v18  ;;  %v3604_v17 = vld [vmem:[%s4848_s10 + $0x30] sm:$0xff]   ;;  %v3605_v18 = vld [vmem:[%s4848_s10 + $0x38] sm:$0xff]  }
 0xf51   :  { %v2220_v22 = vmul.f32 %v3697_v8, %v2212_v4 }
 0xf53   :  { %v2225_v25 = vpack.c.bf16 %v2220_v22, %v2219_v21  ;;  %v2182_v29 = vpop.permute.xlu1 %2181 }
 0xf54   :  { %v2214_v30 = vsel %vm932_vm6, %v2206_v11, %v2182_v29 }
 0xf55   :  { %v2222_v36 = vmul.f32 %v3699_v35, %v2214_v30  ;;  %3447 = vmatpush3.bf16.msra.mxu0 %v2225_v25 }
 0xf56   :  { %3448 = vmatprep.subr.bf16.mxu0 %v3733_v6 }
 0xf57   :  { %v2226_v28 = vpack.c.bf16 %v2222_v36, %v2221_v34 }
 0xf59   :  { %3449 = vmatpush3.bf16.msra.mxu0 %v2226_v28 }
 0xf5a   :  { %3454 = vmatprep.subr.bf16.mxu0 %v3733_v6 }
 0xf5c   :  { %3451 = vmatmul.mubr.msk.bf16.vlgmr.msra.gmra.mrb[48].mxu0 %vm119_vm1, %v3700_v38 }
 0xf5d   :  { %3455 = vmatpush3.bf16.msra.mxu0 %v3598_v37  ;;  %3458 = vmatprep.mubr.msk.bf16.mxu0 %vm3734_vm4, %v3733_v6 }
 0xf5e   :  { %3456 = vmatprep.subr.bf16.mxu0 %v3733_v6 }
 0xf61   :  { %3457 = vmatpush3.bf16.msra.mxu0 %v3599_v39 }
 0xf62   :  { %3469 = vmatprep.subr.bf16.mxu0 %v3733_v6 }
0x102f   :  { %v2261_v45 = vpop.f32.mrb[48].mxu0 }
0x1030   :  { %v3452_v46 = vpop.f32.mrb[49].mxu0 }
0x1031   :  { %v2264_v47 = vpop.f32.mrb[50].mxu0 }
0x1032   :  { %v2268_v48 = vpack.c.bf16 %v2264_v47, %v2261_v45  ;;  %v3453_v31 = vpop.f32.mrb[51].mxu0 }
0x1034   :  { %3459 = vmatmul.mubr.msk.bf16.vlgmr.msra.gmra.mrb[52].mxu0 %vm116_vm0, %v2268_v48 }
0x1035   :  { %3473 = vmatprep.mubr.msk.bf16.mxu0 %vm3734_vm4, %v3733_v6  ;;  %3470 = vmatpush3.bf16.msra.mxu0 %v3600_v33 }
0x1036   :  { %3471 = vmatprep.subr.bf16.mxu0 %v3733_v6 }
0x1107   :  { %v2331_v53 = vpop.f32.mrb[52].mxu0 }
0x1108   :  { %v2332_v58 = vadd.f32 %v2992_v41, %v2331_v53  ;;  %v3460_v61 = vpop.f32.mrb[53].mxu0 }
0x1109   :  { %v2334_v0 = vpop.f32.mrb[54].mxu0 }
0x110a   :  { %v2338_v1 = vadd.f32 %v2332_v58, %v4357_v27  ;;  %v2335_v7 = vadd.f32 %v2992_v41, %v2334_v0  ;;  %v3461_v3 = vpop.f32.mrb[55].mxu0  ;;  %v3601_v27 = vld [vmem:[%s4847_s9 + $0x18] sm:$0xff]  }
0x110b   :  { %3472 = vmatpush3.bf16.msra.mxu0 %v3601_v27 }
0x110c   :  { %v2339_v9 = vadd.f32 %v4353_v26, %v2335_v7  ;;  %v3602_v26 = vld [vmem:[%s4848_s10 + $0x20] sm:$0xff]  }
0x110e   :  { %v3511_v5 = vpack.c.bf16 %v2339_v9, %v2338_v1 }
0x1110   :  { %3512 = vmatprep.subr.bf16.mxu1 %v3511_v5 }
0x1111   :  { %3514 = vmatpush3.bf16.msra.mxu1 %v3511_v5 }
0x1112   :  { %3477 = vmatprep.subr.bf16.mxu1 %v3733_v6 }
0x1114   :  { %3467 = vmatmul.mubr.msk.f32.vlgmr.msra.gmra.mrb[30].mxu1 %vm923_vm5, %v3701_v10 }
0x1115   :  { %3485 = vmatprep.mubr.msk.bf16.mxu1 %vm3734_vm4, %v3733_v6  ;;  %3478 = vmatpush3.bf16.msra.mxu1 %v3602_v26 }
0x1116   :  { %3479 = vmatprep.subr.bf16.mxu1 %v3733_v6 }
0x1119   :  { %3480 = vmatpush3.bf16.msra.mxu1 %v3603_v13 }
0x111a   :  { %3481 = vmatprep.subr.bf16.mxu1 %v3733_v6 }
0x111d   :  { %3482 = vmatpush3.bf16.msra.mxu1 %v3604_v17 }
0x111e   :  { %3483 = vmatprep.subr.bf16.mxu1 %v3733_v6 }
0x1121   :  { %3484 = vmatpush3.bf16.msra.mxu1 %v3605_v18 }
0x11e7   :  { %v3468_v14 = vpop.f32.mrb[30].mxu1 }
0x11e8   :  { %v2406_v2 = vpop.f32.mrb[31].mxu1 }
0x11e9   :  { %v2415_v15 = vpack.c.bf16 %v3468_v14, %v2406_v2 }
0x11eb   :  { %3474 = vmatmul.mubr.msk.bf16.vlgmr.msra.gmra.mrb[56].mxu0 %vm116_vm0, %v2415_v15 }
0x11ec   :  { %3493 = vmatprep.mubr.msk.f32.mxu0 %vm923_vm5, %v3702_v16 }
0x12be   :  { %v2470_v19 = vpop.f32.mrb[56].mxu0 }
0x12bf   :  { %v3475_v4 = vpop.f32.mrb[57].mxu0  ;;  %v2477_v12 = vmax.f32 %v2470_v19, 0.0 }
0x12c0   :  { %v2473_v20 = vpop.f32.mrb[58].mxu0 }
0x12c1   :  { %v2478_v21 = vmax.f32 %v2473_v20, 0.0  ;;  %v3476_v8 = vpop.f32.mrb[59].mxu0 }
0x12c3   :  { %v2479_v22 = vpack.c.bf16 %v2478_v21, %v2477_v12 }
0x12c5   :  { %3486 = vmatmul.mubr.msk.bf16.vlgmr.msra.gmra.mrb[56].mxu1 %vm119_vm1, %v2479_v22 }
0x1398   :  { %v2550_v23 = vpop.f32.mrb[56].mxu1 }
0x1399   :  { %v2557_v24 = vadd.f32 %v2550_v23, %v2406_v2  ;;  %v3487_v11 = vpop.f32.mrb[57].mxu1 }
0x139a   :  { %v2553_v25 = vpop.f32.mrb[58].mxu1 }
0x139b   :  { %v2558_v29 = vadd.f32 %v3468_v14, %v2553_v25  ;;  %v3488_v6 = vpop.f32.mrb[59].mxu1  ;;  %v3021_v14 = vld [vmem:[%s4856_s18] ss:$0 sm:$0xff] }
0x139d   :  { %v3515_v30 = vpack.c.bf16 %v2558_v29, %v2557_v24 }
0x139f   :  { %3516 = vmatprep.subr.bf16.mxu0 %v3515_v30 }
0x13a0   :  { %3518 = vmatpush3.bf16.msra.mxu0 %v3515_v30 }
0x13a3   :  { %3494 = vmatmul.mubr.msk.f32.vlgmr.msra.gmra.mrb[26].mxu0 %vm923_vm5, %v3701_v10 }
0x1476   :  { %v3495_v32 = vpop.f32.mrb[26].mxu0 }
0x1477   :  { %v2625_v34 = vpop.f32.mrb[27].mxu0  ;;  %v2637_v35 = vsel %vm116_vm0, %v3495_v32, 0.0 }
0x1478   :  { %2638 = vadd.xlane.f32.xlu1 %v2637_v35  ;;  %v2634_v36 = vsel %vm116_vm0, %v2625_v34, 0.0 }
0x1479   :  { %2635 = vadd.xlane.f32.xlu0 %v2634_v36 }
0x1489   :  { %2772 = vrot.lane.b32.xlu1 %v4561_v40, %s4881_s28 }
0x148d   :  { %2776 = vrot.lane.b32.xlu1 %v4568_v51, %s4881_s28 }
0x1491   :  { %2778 = vrot.lane.b32.xlu1 %v4570_v52, %s4881_s28 }
0x1495   :  { %2782 = vrot.lane.b32.xlu1 %v4577_v57, %s4881_s28 }
0x1499   :  { %2786 = vrot.lane.b32.xlu1 %v4583_v63, %s4881_s28 }
0x1505   :  { %v2639_v28 = vpop.xlane.xlu1 %2638 }
0x1506   :  { %v2642_v37 = vmul.f32 0.03125, %v2639_v28  ;;  %v2636_v38 = vpop.xlane.xlu0 %2635 }
0x1507   :  { %v2641_v39 = vmul.f32 0.03125, %v2636_v38 }
0x1508   :  { %v2644_v45 = vsub.f32 %v3495_v32, %v2642_v37 }
0x1509   :  { %v2643_v46 = vsub.f32 %v2625_v34, %v2641_v39  ;;  %v2773_v47 = vpop.permute.xlu1 %2772 }
0x150a   :  { %v2796_v40 = vsel %vm119_vm1, %v4101_v43, %v2773_v47  ;;  %v2646_v48 = vmul.f32 %v2644_v45, %v2644_v45 }
0x150b   :  { %2804 = vst [vmem:[%s4858_s20] sm:$0xff] %v2796_v40  ;;  %v2645_v51 = vmul.f32 %v2643_v46, %v2643_v46 }
0x150c   :  { %v2650_v43 = vsel %vm116_vm0, %v2646_v48, 0.0 }
0x150d   :  { %v2777_v52 = vpop.permute.xlu1 %2776  ;;  %v2647_v57 = vsel %vm116_vm0, %v2645_v51, 0.0 }
0x150e   :  { %v2798_v63 = vsel %vm119_vm1, %v4108_v49, %v2777_v52  ;;  %2648 = vadd.xlane.f32.xlu0 %v2647_v57 }
0x150f   :  { %2806 = vst [vmem:[%s4858_s20 + $0x10] sm:$0xff] %v2798_v63 }
0x1511   :  { %v2779_v31 = vpop.permute.xlu1 %2778 }
0x1512   :  { %v2799_v33 = vsel %vm119_vm1, %v4110_v50, %v2779_v31  ;;  %2651 = vadd.xlane.f32.xlu0 %v2650_v43  ;;  %v2679_v50 = vld [vmem:[%s4850_s12] sm:$0xff] }
0x1513   :  { %2807 = vst [vmem:[%s4858_s20 + $0x18] sm:$0xff] %v2799_v33  ;;  %3500 = vmatprep.mubr.msk.f32.mxu0 %vm923_vm5, %v2679_v50 }
0x1515   :  { %v2783_v41 = vpop.permute.xlu1 %2782 }
0x1516   :  { %v2801_v49 = vsel %vm119_vm1, %v4117_v56, %v2783_v41 }
0x1517   :  { %2809 = vst [vmem:[%s4858_s20 + $0x28] sm:$0xff] %v2801_v49 }
0x1519   :  { %v2787_v53 = vpop.permute.xlu1 %2786 }
0x151a   :  { %v2803_v58 = vsel %vm119_vm1, %v4123_v60, %v2787_v53 }
0x151b   :  { %2811 = vst [vmem:[%s4858_s20 + $0x38] sm:$0xff] %v2803_v58 }
0x1528   :  { %2774 = vrot.lane.b32.xlu0 %v4563_v42, %s4881_s28 }
0x152c   :  { %2780 = vrot.lane.b32.xlu0 %v4575_v54, %s4881_s28 }
0x1530   :  { %2784 = vrot.lane.b32.xlu0 %v4581_v62, %s4881_s28 }
0x159b   :  { %v2649_v56 = vpop.xlane.xlu0 %2648 }
0x159c   :  { %v2653_v60 = vmul.f32 0.03125, %v2649_v56 }
0x159e   :  { %v2655_v61 = vadd.f32 1e-05, %v2653_v60 }
0x159f   :  { %v2652_v0 = vpop.xlane.xlu0 %2651 }
0x15a0   :  { %3670 = vrsqrt.f32 %v2655_v61  ;;  %v2654_v1 = vmul.f32 0.03125, %v2652_v0 }
0x15a2   :  { %v2656_v7 = vadd.f32 1e-05, %v2654_v1 }
0x15a3   :  { %v2775_v42 = vpop.permute.xlu0 %2774 }
0x15a4   :  { %3672 = vrsqrt.f32 %v2656_v7  ;;  %v2797_v54 = vsel %vm119_vm1, %v4103_v44, %v2775_v42  ;;  %v3020_v44 = vld [vmem:[%s4855_s17] ss:$0 sm:$0xff]  ;;  %s3735_s17 = smov [#allocation2]  }
0x15a5   :  { %2805 = vst [vmem:[%s4858_s20 + $0x8] sm:$0xff] %v2797_v54 }
0x15a7   :  { %v2781_v62 = vpop.permute.xlu0 %2780 }
0x15a8   :  { %v2800_v3 = vsel %vm119_vm1, %v4115_v55, %v2781_v62 }
0x15a9   :  { %2808 = vst [vmem:[%s4858_s20 + $0x20] sm:$0xff] %v2800_v3 }
0x15aa   :  { %v3671_v9 = vpop.eup %3670 }
0x15ab   :  { %v2785_v5 = vpop.permute.xlu0 %2784  ;;  %v2659_v10 = vmul.f32 %v3671_v9, %v2643_v46 }
0x15ac   :  { %v2802_v27 = vsel %vm119_vm1, %v4121_v59, %v2785_v5  ;;  %v2680_v59 = vld [vmem:[%s4850_s12 + $0x8] sm:$0xff] }
0x15ad   :  { %2810 = vst [vmem:[%s4858_s20 + $0x30] sm:$0xff] %v2802_v27  ;;  %v2668_v13 = vmul.f32 %v3020_v44, %v2659_v10  ;;  %s2817_s20 = sshll.u32 %s3735_s17, 4  ;;  %s2818_s20 = int_to_ptr.vmem [resolvable:$true] %s2817_s20 }
0x15ae   :  { %v3673_v26 = vpop.eup %3672  ;;  %s3703_s18 = scalar_lea.vmem %s2818_s20, 256  ;;  %p3708_p1 = scmp.lt.s32.totalorder %s2818_s20, %s2818_s20 }
0x15af   :  { %v2660_v55 = vmul.f32 %v3673_v26, %v2644_v45  ;;  %v2677_v15 = vadd.f32 %v3021_v14, %v2668_v13  ;;  %p3704_p0 = scmp.ne.s32.totalorder %s2818_s20, %s3703_s18  ;;  %p3709_p2 = scmp.lt.s32.totalorder %s3703_s18, %s3703_s18 }
0x15b1   :  { %v2669_v2 = vmul.f32 %v3020_v44, %v2660_v55  ;;  %p3710_p3 = por %p3709_p2, %p3708_p1 }
0x15b3   :  { %v2678_v16 = vadd.f32 %v3021_v14, %v2669_v2  ;;  %p3711_p4 = pnand %p3710_p3, %p3704_p0 }
0x15b5   :  { %v3519_v17 = vpack.c.bf16 %v2678_v16, %v2677_v15 }
0x15b7   :  { %3520 = vmatprep.subr.bf16.mxu0 %v3519_v17 }
0x15b8   :  { %3522 = vmatpush3.bf16.msra.mxu0 %v3519_v17 }
0x15bb   :  { %3501 = vmatmul.mubr.msk.f32.vlgmr.msra.gmra.mrb[60].mxu0 %vm923_vm5, %v2680_v59 }
0x168e   :  { %v3502_v18 = vpop.f32.mrb[60].mxu0 }
0x168f   :  { %2763 = vst.msk [vmem:[#allocation2 + $0x8] sm:$0xff] %vm116_vm0, %v3502_v18  ;;  %v2753_v19 = vpop.f32.mrb[61].mxu0 }
0x1690   :  { %2762 = vst.msk [vmem:[#allocation2] sm:$0xff] %vm116_vm0, %v2753_v19 }
0x1691   :  { %3714 = shalt.err (!%p3711_p4)
}
0x1692   :  { %s3715_s10 = scalar_lea.hbm %s4857_s19, 256 }
0x1693   :  { %p3716_p5 = scmp.ne.s32.totalorder %s4857_s19, %s3715_s10  ;;  %p3719_p6 = scmp.lt.u32.totalorder %s3715_s10, %s4857_s19 }
0x1695   :  { %p3721_p7 = pnand %p3719_p6, %p3716_p5 }
0x1697   :  { %3724 = shalt.err (!%p3721_p7)
}
0x1698   :  { %s3736_s4 = smov 128  }
0x1699   :  { %2823 = dma.vmem_to_hbm [thread:$0]  %s2818_s20, 256, %s4857_s19, [#allocation3], %s3736_s4, %s3736_s4, %s3730_s27  }
0x169a   :  { %3725 = dma.done.wait [#allocation3], 256  }
0x169b   :  { %3726 = vsyncadd [#allocation3], 4294967040 }
0x169c   :  { %2831 = vsyncpa [#allocation3], 1 }

</bundles_post_ra>
